<compile_context>
chip_gen: v7x
topology: tpu7x:2x2x1
jax: 0.10.0
libtpu: 0.0.40
codegen_flags: <defaults>
</compile_context>

<pallas_src>
import jax
import jax.numpy as jnp
from jax.experimental import pallas as pl
from jax.experimental.pallas import tpu as pltpu


def commnet_kernel(x_ref, e_ref, et_ref, it_ref,
                   we_ref, be_ref,
                   wfh_ref, wfc_ref, bf_ref,
                   wah_ref, wac_ref, ba_ref,
                   out_ref):
    """One grid step = B_blk batch elements, flattened to M = B_blk*n rows.

    Shapes seen by the kernel:
      x_ref   : (M, S)       f32     (M = B_blk * n flattened rows)
      e_ref   : (M, B_blk)   f32     one-hot batch selector   E[r,b]  = [r//n == b]
      et_ref  : (B_blk, M)   f32     E^T
      it_ref  : (M, n)       f32     one-hot agent selector   I[r,j]  = [r% n == j]
      we_ref  : (S, H) bf16          be_ref : (1, H) f32
      wfh_ref : (k, H, H) bf16       wfc_ref: (k, H, H) f32   bf_ref : (k, H) f32
      wah_ref : (H, A_pad) bf16      wac_ref: (H, A_pad) f32  ba_ref : (1, A_pad) f32
      out_ref : (M, A_pad)   f32     lane-dense padded action dim
    """
    hidden = we_ref.shape[1]
    inv_h = 1.0 / hidden

    e_mat = e_ref[...]        # (M, B_blk)
    et_mat = et_ref[...]      # (B_blk, M)
    i_tile = it_ref[...]      # (M, n)

    def comm_rows(h_bf, w_c):
        # torch: c[i, j] = mean_d h[j, d] within one batch element (rank-1), so
        # the c @ W_c contribution added to every row of batch b is
        #     (1/H) * sum_j rowsum(h)[b, j] * W_c[j, :].
        # All contractions run on the (otherwise idle) MXU via one-hot selectors.
        s = jnp.sum(h_bf.astype(jnp.float32), axis=1, keepdims=True)       # (M, 1)
        sm = s * i_tile                                                     # (M, n)
        r = jnp.dot(et_mat, sm, preferred_element_type=jnp.float32)        # (B_blk, n)
        c = inv_h * jnp.dot(r, w_c, preferred_element_type=jnp.float32)    # (B_blk, out)
        return jnp.dot(e_mat, c, preferred_element_type=jnp.float32)       # (M, out)

    # --- encoder: h = relu(x @ W_enc + b_enc) --------------------------------
    x_bf = x_ref[...].astype(jnp.bfloat16)
    enc = (jnp.dot(x_bf, we_ref[...], preferred_element_type=jnp.float32)
           + be_ref[...])
    h = jnp.maximum(enc, 0.0).astype(jnp.bfloat16)                          # (M, H)

    # --- k communication layers: h = tanh(h @ W_h + comm + b) ----------------
    k = wfh_ref.shape[0]
    for i in range(k):  # k is a small static constant -> unrolled
        comm = comm_rows(h, wfc_ref[i])
        pre = (jnp.dot(h, wfh_ref[i], preferred_element_type=jnp.float32)
               + comm + bf_ref[pl.ds(i, 1), :])
        h = jnp.tanh(pre.astype(jnp.bfloat16))   # bf16 EUP on v6e/v7x

    # --- action head ----------------------------------------------------------
    comm = comm_rows(h, wac_ref[...])
    out_ref[...] = (jnp.dot(h, wah_ref[...], preferred_element_type=jnp.float32)
                    + comm + ba_ref[...]).astype(out_ref.dtype)


def commnet_forward(x, w_enc, b_enc, w_f, b_f, w_act, b_act):
    """Batched CommNet forward.

    x      : (B, n, S) f32
    w_enc  : (S, H)      b_enc : (1, H)
    w_f    : (k, 2H, H)  b_f   : (k, 1, H)
    w_act  : (2H, A)     b_act : (1, A)
    returns: (B, n, A) f32
    """
    B, n, S = x.shape
    H = w_enc.shape[1]
    k = w_f.shape[0]
    A = w_act.shape[1]
    assert n == H, "CommNetwork shape algebra requires num_agents == hidden_size"

    # --- batch folding / block-size selection ---------------------------------
    # Target ~256 flattened rows per grid step (one 256-high MXU pass on
    # v6e/v7x, 2x128 on v5e); keep >=2 grid steps whenever B >= 2 so both v7x
    # TensorCores receive work under dimension_semantics=("parallel",).
    b_blk = max(1, min(B, max(1, 256 // n)))
    if B >= 2 and pl.cdiv(B, b_blk) < 2:
        b_blk = pl.cdiv(B, 2)
    if (b_blk * n) % 8 != 0:
        b_blk = B                      # single full block is always layout-legal
    grid = pl.cdiv(B, b_blk)
    b_pad = grid * b_blk
    m_blk = b_blk * n
    m_rows = b_pad * n

    # --- weight preprocessing: split (2H, out) into h-part (MXU, bf16) and
    #     comm-part (kept f32). -------------------------------------------------
    wf_h = w_f[:, :H, :].astype(jnp.bfloat16)           # (k, H, H)
    wf_c = w_f[:, H:, :].astype(jnp.float32)            # (k, H, H)
    wa_h = w_act[:H, :]
    wa_c = w_act[H:, :]

    a_pad = pl.cdiv(A, 128) * 128                       # lane-dense output
    pad2 = ((0, 0), (0, a_pad - A))
    wa_h_p = jnp.pad(wa_h, pad2).astype(jnp.bfloat16)   # (H, A_pad)
    wa_c_p = jnp.pad(wa_c, pad2).astype(jnp.float32)    # (H, A_pad)
    ba_p = jnp.pad(b_act, pad2).astype(jnp.float32)     # (1, A_pad)

    w_enc_bf = w_enc.astype(jnp.bfloat16)
    be = b_enc.reshape(1, H).astype(jnp.float32)        # (1, H)
    bf = b_f.reshape(k, H).astype(jnp.float32)          # (k, H) compact slab

    # --- flattened activations + one-hot selector constants --------------------
    if b_pad != B:
        x = jnp.pad(x, ((0, b_pad - B), (0, 0), (0, 0)))
    x_flat = x.reshape(m_rows, S)

    rows = jnp.arange(m_blk)
    e_mat = (rows[:, None] // n == jnp.arange(b_blk)[None, :]).astype(jnp.float32)
    et_mat = e_mat.T
    i_tile = (rows[:, None] % n == jnp.arange(n)[None, :]).astype(jnp.float32)

    # --- advisory cost estimate -------------------------------------------------
    main_flops = 2 * m_rows * (S * H + k * H * H + H * a_pad)
    comm_flops = 2 * grid * (k + 1) * (b_blk * m_blk * n
                                       + b_blk * n * a_pad
                                       + m_blk * b_blk * a_pad)
    weight_bytes = (w_enc_bf.size * 2 + wf_h.size * 2 + wa_h_p.size * 2
                    + wf_c.size * 4 + wa_c_p.size * 4
                    + be.size * 4 + bf.size * 4 + ba_p.size * 4
                    + (e_mat.size + et_mat.size + i_tile.size) * 4)
    cost = pl.CostEstimate(
        flops=main_flops + comm_flops,
        transcendentals=m_rows * k * H,
        bytes_accessed=x_flat.size * 4 + m_rows * a_pad * 4 + weight_bytes)

    def full_spec(shape):
        return pl.BlockSpec(shape, lambda i, _r=len(shape): (0,) * _r)

    out_flat = pl.pallas_call(
        commnet_kernel,
        out_shape=jax.ShapeDtypeStruct((m_rows, a_pad), jnp.float32),
        grid=(grid,),
        in_specs=[
            pl.BlockSpec((m_blk, S), lambda i: (i, 0)),   # x (flattened rows)
            full_spec((m_blk, b_blk)),                    # E
            full_spec((b_blk, m_blk)),                    # E^T
            full_spec((m_blk, n)),                        # I_tile
            full_spec((S, H)),                            # w_enc (bf16)
            full_spec((1, H)),                            # b_enc
            full_spec((k, H, H)),                         # wf_h (bf16)
            full_spec((k, H, H)),                         # wf_c (f32)
            full_spec((k, H)),                            # b_f
            full_spec((H, a_pad)),                        # wa_h (bf16)
            full_spec((H, a_pad)),                        # wa_c (f32)
            full_spec((1, a_pad)),                        # b_act
        ],
        out_specs=pl.BlockSpec((m_blk, a_pad), lambda i: (i, 0)),
        compiler_params=pltpu.CompilerParams(
            dimension_semantics=("parallel",)),
        cost_estimate=cost,
    )(x_flat, e_mat, et_mat, i_tile, w_enc_bf, be, wf_h, wf_c, bf,
      wa_h_p, wa_c_p, ba_p)

    return out_flat.reshape(b_pad, n, a_pad)[:B, :, :A]


def commnet_ref(x, w_enc, b_enc, w_f, b_f, w_act, b_act):
    """Pure-JAX f32 reference mirroring the torch module literally (per batch)."""
    def single(xb):
        n = xb.shape[0]
        h = jax.nn.relu(xb @ w_enc + b_enc)
        for i in range(w_f.shape[0]):
            h_mean = jnp.mean(h, axis=1)          # (n,)  == torch.mean(h, 1)
            c = jnp.tile(h_mean, (n, 1))          # (n, n) == .repeat((n, 1))
            hc = jnp.concatenate([h, c], axis=1)
            h = jnp.tanh(hc @ w_f[i] + b_f[i])
        h_mean = jnp.mean(h, axis=1)
        c = jnp.tile(h_mean, (n, 1))
        hc = jnp.concatenate([h, c], axis=1)
        return hc @ w_act + b_act
    return jax.vmap(single)(x)


def _linear_init(key, fan_in, fan_out):
    """Deterministic PyTorch-Linear-style uniform init; weight as (in, out)."""
    kw, kb = jax.random.split(key)
    bound = 1.0 / jnp.sqrt(jnp.float32(fan_in))
    w = jax.random.uniform(kw, (fan_in, fan_out), jnp.float32, -bound, bound)
    b = jax.random.uniform(kb, (1, fan_out), jnp.float32, -bound, bound)
    return w, b


if __name__ == "__main__":
    # The module's shape algebra requires num_agents == hidden_size.
    batch = 4
    num_agents = 32
    state_size = 16
    hidden_size = 32
    action_size = 8
    k = 3

    root = jax.random.PRNGKey(0)
    kx, kenc, kact, *kfs = jax.random.split(root, 3 + k)

    x = jax.random.normal(kx, (batch, num_agents, state_size), jnp.float32)

    w_enc, b_enc = _linear_init(kenc, state_size, hidden_size)
    wf_list, bf_list = [], []
    for kk in kfs:
        w, b = _linear_init(kk, 2 * hidden_size, hidden_size)
        wf_list.append(w)
        bf_list.append(b)
    w_f = jnp.stack(wf_list, axis=0)            # (k, 2H, H)
    b_f = jnp.stack(bf_list, axis=0)            # (k, 1, H)
    w_act, b_act = _linear_init(kact, 2 * hidden_size, action_size)

    out = commnet_forward(x, w_enc, b_enc, w_f, b_f, w_act, b_act)
    out = jax.block_until_ready(out)

    expected = commnet_ref(x, w_enc, b_enc, w_f, b_f, w_act, b_act)
    assert out.shape == (batch, num_agents, action_size)
    # bf16 MXU operands + bf16 tanh -> loosened tolerance vs the f32 reference.
    assert jnp.allclose(out, expected, rtol=3e-2, atol=3e-2), (
        "Pallas kernel output mismatch vs JAX reference: "
        f"max abs err = {jnp.max(jnp.abs(out - expected))}"
    )
    print("KERNEL_OK")
</pallas_src>

<mosaic_0001>
module attributes {stable_mosaic.version = 11 : i64} {
  func.func @commnet_kernel(%arg0: i32, %arg1: memref<64x16xf32, #tpu.memory_space<vmem>>, %arg2: memref<64x2xf32, #tpu.memory_space<vmem>>, %arg3: memref<2x64xf32, #tpu.memory_space<vmem>>, %arg4: memref<64x32xf32, #tpu.memory_space<vmem>>, %arg5: memref<16x32xbf16, #tpu.memory_space<vmem>>, %arg6: memref<1x32xf32, #tpu.memory_space<vmem>>, %arg7: memref<3x32x32xbf16, #tpu.memory_space<vmem>>, %arg8: memref<3x32x32xf32, #tpu.memory_space<vmem>>, %arg9: memref<3x32xf32, #tpu.memory_space<vmem>>, %arg10: memref<32x128xbf16, #tpu.memory_space<vmem>>, %arg11: memref<32x128xf32, #tpu.memory_space<vmem>>, %arg12: memref<1x128xf32, #tpu.memory_space<vmem>>, %arg13: memref<64x128xf32, #tpu.memory_space<vmem>>) attributes {dimension_semantics = [#tpu.dimension_semantics<parallel>], iteration_bounds = array<i64: 2>, scalar_prefetch = 0 : i64, scratch_operands = 0 : i64, tpu.core_type = #tpu.core_type<tc>, window_params = [{transform_indices = @transform_0, window_bounds = array<i64: 64, 16>}, {pipeline_mode = #tpu.pipeline_mode<synchronous>, transform_indices = @transform_1, window_bounds = array<i64: 64, 2>}, {pipeline_mode = #tpu.pipeline_mode<synchronous>, transform_indices = @transform_2, window_bounds = array<i64: 2, 64>}, {pipeline_mode = #tpu.pipeline_mode<synchronous>, transform_indices = @transform_3, window_bounds = array<i64: 64, 32>}, {pipeline_mode = #tpu.pipeline_mode<synchronous>, transform_indices = @transform_4, window_bounds = array<i64: 16, 32>}, {pipeline_mode = #tpu.pipeline_mode<synchronous>, transform_indices = @transform_5, window_bounds = array<i64: 1, 32>}, {pipeline_mode = #tpu.pipeline_mode<synchronous>, transform_indices = @transform_6, window_bounds = array<i64: 3, 32, 32>}, {pipeline_mode = #tpu.pipeline_mode<synchronous>, transform_indices = @transform_7, window_bounds = array<i64: 3, 32, 32>}, {pipeline_mode = #tpu.pipeline_mode<synchronous>, transform_indices = @transform_8, window_bounds = array<i64: 3, 32>}, {pipeline_mode = #tpu.pipeline_mode<synchronous>, transform_indices = @transform_9, window_bounds = array<i64: 32, 128>}, {pipeline_mode = #tpu.pipeline_mode<synchronous>, transform_indices = @transform_10, window_bounds = array<i64: 32, 128>}, {pipeline_mode = #tpu.pipeline_mode<synchronous>, transform_indices = @transform_11, window_bounds = array<i64: 1, 128>}, {transform_indices = @transform_12, window_bounds = array<i64: 64, 128>}]} {
    %c0 = arith.constant 0 : index
    %c0_0 = arith.constant 0 : index
    %0 = vector.load %arg2[%c0, %c0_0] : memref<64x2xf32, #tpu.memory_space<vmem>>, vector<64x2xf32>
    %c0_1 = arith.constant 0 : index
    %c0_2 = arith.constant 0 : index
    %1 = vector.load %arg3[%c0_1, %c0_2] : memref<2x64xf32, #tpu.memory_space<vmem>>, vector<2x64xf32>
    %c0_3 = arith.constant 0 : index
    %c0_4 = arith.constant 0 : index
    %2 = vector.load %arg4[%c0_3, %c0_4] : memref<64x32xf32, #tpu.memory_space<vmem>>, vector<64x32xf32>
    %c0_5 = arith.constant 0 : index
    %c0_6 = arith.constant 0 : index
    %3 = vector.load %arg1[%c0_5, %c0_6] : memref<64x16xf32, #tpu.memory_space<vmem>>, vector<64x16xf32>
    %4 = arith.truncf %3 : vector<64x16xf32> to vector<64x16xbf16>
    %c0_7 = arith.constant 0 : index
    %c0_8 = arith.constant 0 : index
    %5 = vector.load %arg5[%c0_7, %c0_8] : memref<16x32xbf16, #tpu.memory_space<vmem>>, vector<16x32xbf16>
    %cst = arith.constant dense<0.000000e+00> : vector<64x32xf32>
    %6 = tpu.matmul %4, %5, %cst {dimension_numbers = #tpu.dot_dimension_numbers<[1], [0], [0], [1], [0, 0, 1, 1], [], []>} : vector<64x16xbf16>, vector<16x32xbf16>, vector<64x32xf32> -> vector<64x32xf32>
    %c0_9 = arith.constant 0 : index
    %c0_10 = arith.constant 0 : index
    %7 = vector.load %arg6[%c0_9, %c0_10] : memref<1x32xf32, #tpu.memory_space<vmem>>, vector<1x32xf32>
    %8 = vector.broadcast %7 : vector<1x32xf32> to vector<64x32xf32>
    %9 = arith.addf %6, %8 : vector<64x32xf32>
    %cst_11 = arith.constant 0.000000e+00 : f32
    %10 = vector.broadcast %cst_11 : f32 to vector<64x32xf32>
    %11 = arith.maximumf %9, %10 : vector<64x32xf32>
    %12 = arith.truncf %11 : vector<64x32xf32> to vector<64x32xbf16>
    %c0_12 = arith.constant 0 : index
    %c0_13 = arith.constant 0 : index
    %c0_14 = arith.constant 0 : index
    %13 = vector.load %arg8[%c0_12, %c0_13, %c0_14] : memref<3x32x32xf32, #tpu.memory_space<vmem>>, vector<1x32x32xf32>
    %14 = vector.shape_cast %13 : vector<1x32x32xf32> to vector<32x32xf32>
    %15 = arith.extf %12 : vector<64x32xbf16> to vector<64x32xf32>
    %cst_15 = arith.constant dense<0.000000e+00> : vector<64xf32>
    %16 = vector.multi_reduction <add>, %15, %cst_15 [1] : vector<64x32xf32> to vector<64xf32>
    %17 = vector.shape_cast %16 : vector<64xf32> to vector<64x1xf32>
    %18 = vector.broadcast %17 : vector<64x1xf32> to vector<64x32xf32>
    %19 = arith.mulf %18, %2 : vector<64x32xf32>
    %cst_16 = arith.constant dense<0.000000e+00> : vector<2x32xf32>
    %20 = tpu.matmul %1, %19, %cst_16 {dimension_numbers = #tpu.dot_dimension_numbers<[1], [0], [0], [1], [0, 0, 1, 1], [], []>} : vector<2x64xf32>, vector<64x32xf32>, vector<2x32xf32> -> vector<2x32xf32>
    %cst_17 = arith.constant dense<0.000000e+00> : vector<2x32xf32>
    %21 = tpu.matmul %20, %14, %cst_17 {dimension_numbers = #tpu.dot_dimension_numbers<[1], [0], [0], [1], [0, 0, 1, 1], [], []>} : vector<2x32xf32>, vector<32x32xf32>, vector<2x32xf32> -> vector<2x32xf32>
    %cst_18 = arith.constant 3.125000e-02 : f32
    %22 = vector.broadcast %cst_18 : f32 to vector<2x32xf32>
    %23 = arith.mulf %22, %21 : vector<2x32xf32>
    %cst_19 = arith.constant dense<0.000000e+00> : vector<64x32xf32>
    %24 = tpu.matmul %0, %23, %cst_19 {dimension_numbers = #tpu.dot_dimension_numbers<[1], [0], [0], [1], [0, 0, 1, 1], [], []>} : vector<64x2xf32>, vector<2x32xf32>, vector<64x32xf32> -> vector<64x32xf32>
    %c0_20 = arith.constant 0 : index
    %c0_21 = arith.constant 0 : index
    %c0_22 = arith.constant 0 : index
    %25 = vector.load %arg7[%c0_20, %c0_21, %c0_22] : memref<3x32x32xbf16, #tpu.memory_space<vmem>>, vector<1x32x32xbf16>
    %26 = vector.shape_cast %25 : vector<1x32x32xbf16> to vector<32x32xbf16>
    %cst_23 = arith.constant dense<0.000000e+00> : vector<64x32xf32>
    %27 = tpu.matmul %12, %26, %cst_23 {dimension_numbers = #tpu.dot_dimension_numbers<[1], [0], [0], [1], [0, 0, 1, 1], [], []>} : vector<64x32xbf16>, vector<32x32xbf16>, vector<64x32xf32> -> vector<64x32xf32>
    %28 = arith.addf %27, %24 : vector<64x32xf32>
    %c0_24 = arith.constant 0 : index
    %c0_25 = arith.constant 0 : index
    %29 = vector.load %arg9[%c0_24, %c0_25] : memref<3x32xf32, #tpu.memory_space<vmem>>, vector<1x32xf32>
    %30 = vector.broadcast %29 : vector<1x32xf32> to vector<64x32xf32>
    %31 = arith.addf %28, %30 : vector<64x32xf32>
    %32 = arith.truncf %31 : vector<64x32xf32> to vector<64x32xbf16>
    %33 = math.tanh %32 : vector<64x32xbf16>
    %c1 = arith.constant 1 : index
    %c0_26 = arith.constant 0 : index
    %c0_27 = arith.constant 0 : index
    %34 = vector.load %arg8[%c1, %c0_26, %c0_27] : memref<3x32x32xf32, #tpu.memory_space<vmem>>, vector<1x32x32xf32>
    %35 = vector.shape_cast %34 : vector<1x32x32xf32> to vector<32x32xf32>
    %36 = arith.extf %33 : vector<64x32xbf16> to vector<64x32xf32>
    %cst_28 = arith.constant dense<0.000000e+00> : vector<64xf32>
    %37 = vector.multi_reduction <add>, %36, %cst_28 [1] : vector<64x32xf32> to vector<64xf32>
    %38 = vector.shape_cast %37 : vector<64xf32> to vector<64x1xf32>
    %39 = vector.broadcast %38 : vector<64x1xf32> to vector<64x32xf32>
    %40 = arith.mulf %39, %2 : vector<64x32xf32>
    %cst_29 = arith.constant dense<0.000000e+00> : vector<2x32xf32>
    %41 = tpu.matmul %1, %40, %cst_29 {dimension_numbers = #tpu.dot_dimension_numbers<[1], [0], [0], [1], [0, 0, 1, 1], [], []>} : vector<2x64xf32>, vector<64x32xf32>, vector<2x32xf32> -> vector<2x32xf32>
    %cst_30 = arith.constant dense<0.000000e+00> : vector<2x32xf32>
    %42 = tpu.matmul %41, %35, %cst_30 {dimension_numbers = #tpu.dot_dimension_numbers<[1], [0], [0], [1], [0, 0, 1, 1], [], []>} : vector<2x32xf32>, vector<32x32xf32>, vector<2x32xf32> -> vector<2x32xf32>
    %cst_31 = arith.constant 3.125000e-02 : f32
    %43 = vector.broadcast %cst_31 : f32 to vector<2x32xf32>
    %44 = arith.mulf %43, %42 : vector<2x32xf32>
    %cst_32 = arith.constant dense<0.000000e+00> : vector<64x32xf32>
    %45 = tpu.matmul %0, %44, %cst_32 {dimension_numbers = #tpu.dot_dimension_numbers<[1], [0], [0], [1], [0, 0, 1, 1], [], []>} : vector<64x2xf32>, vector<2x32xf32>, vector<64x32xf32> -> vector<64x32xf32>
    %c1_33 = arith.constant 1 : index
    %c0_34 = arith.constant 0 : index
    %c0_35 = arith.constant 0 : index
    %46 = vector.load %arg7[%c1_33, %c0_34, %c0_35] : memref<3x32x32xbf16, #tpu.memory_space<vmem>>, vector<1x32x32xbf16>
    %47 = vector.shape_cast %46 : vector<1x32x32xbf16> to vector<32x32xbf16>
    %cst_36 = arith.constant dense<0.000000e+00> : vector<64x32xf32>
    %48 = tpu.matmul %33, %47, %cst_36 {dimension_numbers = #tpu.dot_dimension_numbers<[1], [0], [0], [1], [0, 0, 1, 1], [], []>} : vector<64x32xbf16>, vector<32x32xbf16>, vector<64x32xf32> -> vector<64x32xf32>
    %49 = arith.addf %48, %45 : vector<64x32xf32>
    %c1_37 = arith.constant 1 : index
    %c0_38 = arith.constant 0 : index
    %50 = vector.load %arg9[%c1_37, %c0_38] : memref<3x32xf32, #tpu.memory_space<vmem>>, vector<1x32xf32>
    %51 = vector.broadcast %50 : vector<1x32xf32> to vector<64x32xf32>
    %52 = arith.addf %49, %51 : vector<64x32xf32>
    %53 = arith.truncf %52 : vector<64x32xf32> to vector<64x32xbf16>
    %54 = math.tanh %53 : vector<64x32xbf16>
    %c2 = arith.constant 2 : index
    %c0_39 = arith.constant 0 : index
    %c0_40 = arith.constant 0 : index
    %55 = vector.load %arg8[%c2, %c0_39, %c0_40] : memref<3x32x32xf32, #tpu.memory_space<vmem>>, vector<1x32x32xf32>
    %56 = vector.shape_cast %55 : vector<1x32x32xf32> to vector<32x32xf32>
    %57 = arith.extf %54 : vector<64x32xbf16> to vector<64x32xf32>
    %cst_41 = arith.constant dense<0.000000e+00> : vector<64xf32>
    %58 = vector.multi_reduction <add>, %57, %cst_41 [1] : vector<64x32xf32> to vector<64xf32>
    %59 = vector.shape_cast %58 : vector<64xf32> to vector<64x1xf32>
    %60 = vector.broadcast %59 : vector<64x1xf32> to vector<64x32xf32>
    %61 = arith.mulf %60, %2 : vector<64x32xf32>
    %cst_42 = arith.constant dense<0.000000e+00> : vector<2x32xf32>
    %62 = tpu.matmul %1, %61, %cst_42 {dimension_numbers = #tpu.dot_dimension_numbers<[1], [0], [0], [1], [0, 0, 1, 1], [], []>} : vector<2x64xf32>, vector<64x32xf32>, vector<2x32xf32> -> vector<2x32xf32>
    %cst_43 = arith.constant dense<0.000000e+00> : vector<2x32xf32>
    %63 = tpu.matmul %62, %56, %cst_43 {dimension_numbers = #tpu.dot_dimension_numbers<[1], [0], [0], [1], [0, 0, 1, 1], [], []>} : vector<2x32xf32>, vector<32x32xf32>, vector<2x32xf32> -> vector<2x32xf32>
    %cst_44 = arith.constant 3.125000e-02 : f32
    %64 = vector.broadcast %cst_44 : f32 to vector<2x32xf32>
    %65 = arith.mulf %64, %63 : vector<2x32xf32>
    %cst_45 = arith.constant dense<0.000000e+00> : vector<64x32xf32>
    %66 = tpu.matmul %0, %65, %cst_45 {dimension_numbers = #tpu.dot_dimension_numbers<[1], [0], [0], [1], [0, 0, 1, 1], [], []>} : vector<64x2xf32>, vector<2x32xf32>, vector<64x32xf32> -> vector<64x32xf32>
    %c2_46 = arith.constant 2 : index
    %c0_47 = arith.constant 0 : index
    %c0_48 = arith.constant 0 : index
    %67 = vector.load %arg7[%c2_46, %c0_47, %c0_48] : memref<3x32x32xbf16, #tpu.memory_space<vmem>>, vector<1x32x32xbf16>
    %68 = vector.shape_cast %67 : vector<1x32x32xbf16> to vector<32x32xbf16>
    %cst_49 = arith.constant dense<0.000000e+00> : vector<64x32xf32>
    %69 = tpu.matmul %54, %68, %cst_49 {dimension_numbers = #tpu.dot_dimension_numbers<[1], [0], [0], [1], [0, 0, 1, 1], [], []>} : vector<64x32xbf16>, vector<32x32xbf16>, vector<64x32xf32> -> vector<64x32xf32>
    %70 = arith.addf %69, %66 : vector<64x32xf32>
    %c2_50 = arith.constant 2 : index
    %c0_51 = arith.constant 0 : index
    %71 = vector.load %arg9[%c2_50, %c0_51] : memref<3x32xf32, #tpu.memory_space<vmem>>, vector<1x32xf32>
    %72 = vector.broadcast %71 : vector<1x32xf32> to vector<64x32xf32>
    %73 = arith.addf %70, %72 : vector<64x32xf32>
    %74 = arith.truncf %73 : vector<64x32xf32> to vector<64x32xbf16>
    %75 = math.tanh %74 : vector<64x32xbf16>
    %c0_52 = arith.constant 0 : index
    %c0_53 = arith.constant 0 : index
    %76 = vector.load %arg11[%c0_52, %c0_53] : memref<32x128xf32, #tpu.memory_space<vmem>>, vector<32x128xf32>
    %77 = arith.extf %75 : vector<64x32xbf16> to vector<64x32xf32>
    %cst_54 = arith.constant dense<0.000000e+00> : vector<64xf32>
    %78 = vector.multi_reduction <add>, %77, %cst_54 [1] : vector<64x32xf32> to vector<64xf32>
    %79 = vector.shape_cast %78 : vector<64xf32> to vector<64x1xf32>
    %80 = vector.broadcast %79 : vector<64x1xf32> to vector<64x32xf32>
    %81 = arith.mulf %80, %2 : vector<64x32xf32>
    %cst_55 = arith.constant dense<0.000000e+00> : vector<2x32xf32>
    %82 = tpu.matmul %1, %81, %cst_55 {dimension_numbers = #tpu.dot_dimension_numbers<[1], [0], [0], [1], [0, 0, 1, 1], [], []>} : vector<2x64xf32>, vector<64x32xf32>, vector<2x32xf32> -> vector<2x32xf32>
    %cst_56 = arith.constant dense<0.000000e+00> : vector<2x128xf32>
    %83 = tpu.matmul %82, %76, %cst_56 {dimension_numbers = #tpu.dot_dimension_numbers<[1], [0], [0], [1], [0, 0, 1, 1], [], []>} : vector<2x32xf32>, vector<32x128xf32>, vector<2x128xf32> -> vector<2x128xf32>
    %cst_57 = arith.constant 3.125000e-02 : f32
    %84 = vector.broadcast %cst_57 : f32 to vector<2x128xf32>
    %85 = arith.mulf %84, %83 : vector<2x128xf32>
    %cst_58 = arith.constant dense<0.000000e+00> : vector<64x128xf32>
    %86 = tpu.matmul %0, %85, %cst_58 {dimension_numbers = #tpu.dot_dimension_numbers<[1], [0], [0], [1], [0, 0, 1, 1], [], []>} : vector<64x2xf32>, vector<2x128xf32>, vector<64x128xf32> -> vector<64x128xf32>
    %c0_59 = arith.constant 0 : index
    %c0_60 = arith.constant 0 : index
    %87 = vector.load %arg10[%c0_59, %c0_60] : memref<32x128xbf16, #tpu.memory_space<vmem>>, vector<32x128xbf16>
    %cst_61 = arith.constant dense<0.000000e+00> : vector<64x128xf32>
    %88 = tpu.matmul %75, %87, %cst_61 {dimension_numbers = #tpu.dot_dimension_numbers<[1], [0], [0], [1], [0, 0, 1, 1], [], []>} : vector<64x32xbf16>, vector<32x128xbf16>, vector<64x128xf32> -> vector<64x128xf32>
    %89 = arith.addf %88, %86 : vector<64x128xf32>
    %c0_62 = arith.constant 0 : index
    %c0_63 = arith.constant 0 : index
    %90 = vector.load %arg12[%c0_62, %c0_63] : memref<1x128xf32, #tpu.memory_space<vmem>>, vector<1x128xf32>
    %91 = vector.broadcast %90 : vector<1x128xf32> to vector<64x128xf32>
    %92 = arith.addf %89, %91 : vector<64x128xf32>
    %c0_64 = arith.constant 0 : index
    %c0_65 = arith.constant 0 : index
    %93 = vector.load %arg13[%c0_64, %c0_65] : memref<64x128xf32, #tpu.memory_space<vmem>>, vector<64x128xf32>
    tpu.vector_store %arg13[%c0_64, %c0_65], %92 {strides = array<i32>} : memref<64x128xf32, #tpu.memory_space<vmem>>, vector<64x128xf32>,
    return
  }
  func.func @transform_0(%arg0: i32) -> (i32, i32) {
    %c0_i32 = arith.constant 0 : i32
    %c0_i32_0 = arith.constant 0 : i32
    return %arg0, %c0_i32 : i32, i32
  }
  func.func @transform_1(%arg0: i32) -> (i32, i32) {
    %c0_i32 = arith.constant 0 : i32
    %c0_i32_0 = arith.constant 0 : i32
    %c0_i32_1 = arith.constant 0 : i32
    return %c0_i32, %c0_i32_0 : i32, i32
  }
  func.func @transform_2(%arg0: i32) -> (i32, i32) {
    %c0_i32 = arith.constant 0 : i32
    %c0_i32_0 = arith.constant 0 : i32
    %c0_i32_1 = arith.constant 0 : i32
    return %c0_i32, %c0_i32_0 : i32, i32
  }
  func.func @transform_3(%arg0: i32) -> (i32, i32) {
    %c0_i32 = arith.constant 0 : i32
    %c0_i32_0 = arith.constant 0 : i32
    %c0_i32_1 = arith.constant 0 : i32
    return %c0_i32, %c0_i32_0 : i32, i32
  }
  func.func @transform_4(%arg0: i32) -> (i32, i32) {
    %c0_i32 = arith.constant 0 : i32
    %c0_i32_0 = arith.constant 0 : i32
    %c0_i32_1 = arith.constant 0 : i32
    return %c0_i32, %c0_i32_0 : i32, i32
  }
  func.func @transform_5(%arg0: i32) -> (i32, i32) {
    %c0_i32 = arith.constant 0 : i32
    %c0_i32_0 = arith.constant 0 : i32
    %c0_i32_1 = arith.constant 0 : i32
    return %c0_i32, %c0_i32_0 : i32, i32
  }
  func.func @transform_6(%arg0: i32) -> (i32, i32, i32) {
    %c0_i32 = arith.constant 0 : i32
    %c0_i32_0 = arith.constant 0 : i32
    %c0_i32_1 = arith.constant 0 : i32
    %c0_i32_2 = arith.constant 0 : i32
    return %c0_i32, %c0_i32_0, %c0_i32_1 : i32, i32, i32
  }
  func.func @transform_7(%arg0: i32) -> (i32, i32, i32) {
    %c0_i32 = arith.constant 0 : i32
    %c0_i32_0 = arith.constant 0 : i32
    %c0_i32_1 = arith.constant 0 : i32
    %c0_i32_2 = arith.constant 0 : i32
    return %c0_i32, %c0_i32_0, %c0_i32_1 : i32, i32, i32
  }
  func.func @transform_8(%arg0: i32) -> (i32, i32) {
    %c0_i32 = arith.constant 0 : i32
    %c0_i32_0 = arith.constant 0 : i32
    %c0_i32_1 = arith.constant 0 : i32
    return %c0_i32, %c0_i32_0 : i32, i32
  }
  func.func @transform_9(%arg0: i32) -> (i32, i32) {
    %c0_i32 = arith.constant 0 : i32
    %c0_i32_0 = arith.constant 0 : i32
    %c0_i32_1 = arith.constant 0 : i32
    return %c0_i32, %c0_i32_0 : i32, i32
  }
  func.func @transform_10(%arg0: i32) -> (i32, i32) {
    %c0_i32 = arith.constant 0 : i32
    %c0_i32_0 = arith.constant 0 : i32
    %c0_i32_1 = arith.constant 0 : i32
    return %c0_i32, %c0_i32_0 : i32, i32
  }
  func.func @transform_11(%arg0: i32) -> (i32, i32) {
    %c0_i32 = arith.constant 0 : i32
    %c0_i32_0 = arith.constant 0 : i32
    %c0_i32_1 = arith.constant 0 : i32
    return %c0_i32, %c0_i32_0 : i32, i32
  }
  func.func @transform_12(%arg0: i32) -> (i32, i32) {
    %c0_i32 = arith.constant 0 : i32
    %c0_i32_0 = arith.constant 0 : i32
    return %arg0, %c0_i32 : i32, i32
  }
}

</mosaic_0001>

<bundles_post_ra>
// kernel: tpu_custom_call.1
= control target key start
LH: loop header
LB: loop body
LE: loop exit
PB: predicated region body
PF: predicated region fallthrough
CT: control target
= control target key end

     0   :  { %s3599_s0 = inlined_call_operand.vmem [shape: f32[128,16], index: 0, kind: input, shape index: {}]   ;;  %s3600_s1 = inlined_call_operand.vmem [shape: f32[64,2], index: 1, kind: input, shape index: {}]   ;;  %s3601_s2 = inlined_call_operand.vmem [shape: f32[2,64], index: 2, kind: input, shape index: {}]   ;;  %s3602_s3 = inlined_call_operand.vmem [shape: f32[64,32], index: 3, kind: input, shape index: {}]   ;;  %s3603_s4 = inlined_call_operand.vmem [shape: bf16[16,32], index: 4, kind: input, shape index: {}]   ;;  %s3604_s5 = inlined_call_operand.vmem [shape: f32[1,32], index: 5, kind: input, shape index: {}]   ;;  %s3605_s6 = inlined_call_operand.vmem [shape: bf16[3,32,32], index: 6, kind: input, shape index: {}]   ;;  %s3606_s7 = inlined_call_operand.vmem [shape: f32[3,32,32], index: 7, kind: input, shape index: {}]   ;;  %s3607_s8 = inlined_call_operand.vmem [shape: f32[3,32], index: 8, kind: input, shape index: {}]   ;;  %s3608_s9 = inlined_call_operand.vmem [shape: bf16[32,128], index: 9, kind: input, shape index: {}]   ;;  %s3609_s10 = inlined_call_operand.vmem [shape: f32[32,128], index: 10, kind: input, shape index: {}]   ;;  %s3610_s11 = inlined_call_operand.vmem [shape: f32[1,128], index: 11, kind: input, shape index: {}]   ;;  %s3611_s12 = inlined_call_operand.hbm [shape: f32[128,128], index: 12, kind: output, shape index: {}]  }
   0x1   :  { %3612 = sst [smem:[#allocation5_spill]] %s3599_s0 }
   0x2   :  { %17 = vsyncpa [#allocation3], 0 }
   0x3   :  { %19 = vsyncpa [#allocation3 + $0x1], 0  ;;  %s3049_s21 = smov 0   ;;  %s3051_s22 = smov 0  }
   0x4   :  { %s3053_s23 = smov 0   ;;  %s3055_s24 = smov 0  }
   0x5 LB: > { %s3070_s25 = sadd.s32 4294967295, %s2976_s24   ;;  %s2303_s26 = sadd.s32 4294967294, %s2976_s24   ;;  %s2976_s24 = sphi %s3055_s24, %s3619_s24   ;;  %s2972_s23 = sphi %s3053_s23, %s3618_s23   ;;  %s2968_s22 = sphi %s3051_s22, %s3617_s22   ;;  %s2964_s21 = sphi %s3049_s21, %s3616_s21  }
   0x6   : > { %s3074_s27 = sadd.s32 1, %s2976_s24   ;;  %s289_s28 = sadd.s32 1, %s2972_s23 }
   0x7   : > { %s286_s29 = ssub.s32 %s2976_s24, %s3074_s27  ;;  %p299_p0 = scmp.ne.s32.totalorder %s2972_s23, %s2968_s22 }
   0x8   : > { %p287_p1 = scmp.eq.s32.totalorder %s286_s29, 0  ;;  %p300_p2 = scmp.eq.s32.totalorder %s3070_s25, 1 }
   0x9   : > { %p305_p3 = scmp.ne.s32.totalorder %s2968_s22, %s2964_s21  ;;  %p306_p4 = scmp.eq.s32.totalorder %s2303_s26, 1 }
   0xa   : > { %s3085_s30 = scalar_select %p287_p1, %s2972_s23, %s289_s28  }
   0xb   : > { %p3087_p5 = por %p300_p2, %p299_p0  ;;  %p3091_p6 = por %p306_p4, %p305_p3 }
   0xc   : > { %p2306_p7 = scmp.ge.s32.totalorder %s2976_s24, 1  ;;  %p366_p8 = scmp.lt.s32.totalorder %s2976_s24, 3 }
   0xe   : > { %p367_p9 = pnand %p2306_p7, %p366_p8 }
   0xf   : > { %v2881_v0 = vld [vmem:[%s3603_s4] sm:$0xff] (!%p367_p9)   ;;  %s2308_s17 = sshll.u32 (!%p367_p9), %s3070_s25, 3  ;;  %s3615_s0 = sld [smem:[#allocation5_spill]] (!%p367_p9)  ;;  %vm460_vm0 = vcmask (!%p367_p9), 130048   ;;  %vm562_vm1 = vcmask (!%p367_p9), 261120   ;;  %v2978_v58 = vmov (!%p367_p9), 0.0|0.0  }
  0x10   : > { %370 = sbr.rel (%p367_p9) target bundleno = 3560 (0xde8), region = 68  ;;  %p409_p10 = scmp.lt.s32.totalorder (!%p367_p9), %s2308_s17, 15  ;;  %2531 = vmatprep.subr.bf16.mxu0 (!%p367_p9), %v2881_v0  ;;  %v2310_v13 = vld [vmem:[%s3604_s5] ss:$0 sm:$0xff] (!%p367_p9)  ;;  %2765 = vmatprep.subr.bf16.mxu1 (!%p367_p9), %v2978_v58  ;;  %vm2979_vm2 = vmmov (!%p367_p9), 0   ;;  %v2980_v59 = vmov (!%p367_p9), 0.0  }
  0x11   : > { %2532 = vmatpush3.bf16.msra.mxu0 (!%p367_p9), %v2881_v0  ;;  %2557 = vmatprep.mubr.msk.f32.mxu1 (!%p367_p9), %vm2979_vm2, %v2980_v59  ;;  %v550_v60 = vld [vmem:[%s3606_s7] sm:$0xff] (!%p367_p9)  ;;  %v551_v61 = vld [vmem:[%s3606_s7 + $0x8] sm:$0xff] (!%p367_p9)  ;;  %v552_v62 = vld [vmem:[%s3606_s7 + $0x10] sm:$0xff] (!%p367_p9)  ;;  %vm595_vm3 = vcmask (!%p367_p9), 523264   ;;  %vm743_vm4 = vcmask (!%p367_p9), 15360   ;;  %vm768_vm5 = vcmask (!%p367_p9), 1041408  }
  0x12   : > { %2777 = vmatprep.subr.bf16.mxu0 (!%p367_p9), %v2978_v58  ;;  %v2778_v63 = vpack.c.bf16 (!%p367_p9), %v551_v61, %v550_v60  ;;  %v553_v0 = vld [vmem:[%s3606_s7 + $0x18] sm:$0xff] (!%p367_p9)  ;;  %s405_s28 = sand.u32 (!%p367_p9), 1, %s2968_s22   ;;  %s2981_s16 = smov (!%p367_p9), [#allocation2]  }
  0x13   : > { %s2307_s29 = sshll.u32 (!%p367_p9), %s405_s28, 6  ;;  %s2918_s20 = sshll.u32 (!%p367_p9), %s2981_s16, 4  ;;  %s2919_s20 = int_to_ptr.vmem [resolvable:$false] %s2918_s20 }
  0x17   : > { %s3621_s17 = smov (!%p409_p10, %s2308_s17), 15 }
  0x18   : > { %s2309_s18 = sshll.u32 %s3621_s17, 3  ;;  %s407_s17 = scalar_lea.vmem [#allocation2], %s2307_s29 }
  0x19   : > { %s412_s26 = scalar_lea.vmem %s3615_s0, %s2309_s18  ;;  %s2409_s18 = sshll.u32 %s3070_s25, 10 }
  0x1a   : > { %v433_v1 = vld [vmem:[%s412_s26] sm:$0xff]  ;;  %v434_v2 = vld [vmem:[%s412_s26 + $0x8] sm:$0xff]  ;;  %v435_v3 = vld [vmem:[%s412_s26 + $0x10] sm:$0xff]  ;;  %s2241_s19 = sshll.u32 %s407_s17, 4  ;;  %s3552_s29 = scalar_lea.hbm %s3611_s12, %s2409_s18  ;;  %s3554_s19 = int_to_ptr.vmem [resolvable:$true] %s2241_s19 }
  0x1b   : > { %v441_v4 = vpack.c.bf16 %v434_v2, %v433_v1  ;;  %v436_v5 = vld [vmem:[%s412_s26 + $0x18] sm:$0xff]  ;;  %v437_v6 = vld [vmem:[%s412_s26 + $0x20] sm:$0xff]  ;;  %v438_v7 = vld [vmem:[%s412_s26 + $0x28] sm:$0xff]  ;;  %v2781_v1 = vpack.c.bf16 %v553_v0, %v552_v62  ;;  %s3558_s25 = scalar_lea.sflag [#allocation3], %s405_s28  ;;  %s2914_s15 = scalar_lea.vmem %s3554_s19, 1024 }
  0x1c   : > { %v442_v8 = vpack.c.bf16 %v436_v5, %v435_v3  ;;  %v443_v9 = vpack.c.bf16 %v438_v7, %v437_v6  ;;  %v439_v10 = vld [vmem:[%s412_s26 + $0x30] sm:$0xff]  ;;  %v440_v11 = vld [vmem:[%s412_s26 + $0x38] sm:$0xff]  ;;  %v3158_v5 = vld [vmem:[%s3602_s3 + $0x8] sm:$0xff]  ;;  %p2915_p11 = scmp.ne.s32.totalorder %s3554_s19, %s2914_s15  ;;  %s2920_s18 = scalar_lea.vmem %s2919_s20, 2048 }
  0x1d   : > { %2533 = vmatprep.mubr.msk.bf16.mxu0 %vm460_vm0, %v441_v4  ;;  %v444_v12 = vpack.c.bf16 %v440_v11, %v439_v10  ;;  %v3153_v4 = vld [vmem:[%s3602_s3] sm:$0xff]  ;;  %v3163_v7 = vld [vmem:[%s3602_s3 + $0x18] sm:$0xff]  ;;  %v3170_v11 = vld [vmem:[%s3602_s3 + $0x10] sm:$0xff]  ;;  %p2921_p0 = scmp.lt.s32.totalorder %s3554_s19, %s2919_s20  ;;  %p2922_p1 = scmp.lt.s32.totalorder %s2920_s18, %s2914_s15 }
  0x1e   : > { %2534 = vmatmul.mubr.msk.bf16.vlgmr.msra.gmra.mrb[0].mxu0 %vm460_vm0, %v442_v8  ;;  %p2916_p12 = pnand %p2915_p11, %p3087_p5 }
  0x1f   : > { %2537 = vmatprep.mubr.msk.bf16.mxu0 %vm460_vm0, %v443_v9  ;;  %2779 = vmatpush3.bf16.msra.mxu0 %v2778_v63  ;;  %p2923_p2 = por %p2922_p1, %p2921_p0 }
  0x20   : > { %2780 = vmatprep.subr.bf16.mxu0 %v2978_v58  ;;  %p2917_p13 = pneg %p2916_p12 }
  0x22   : > { %p2924_p3 = pnand %p2923_p2, %p2917_p13 }
  0x23   : > { %2782 = vmatpush3.bf16.msra.mxu0 %v2781_v1 }
  0x26   : > { %2538 = vmatmul.mubr.msk.bf16.gmra.mrb[4].mxu0 %vm460_vm0, %v444_v12 }
  0x27   : > { %2568 = vmatprep.mubr.msk.f32.mxu0 %vm2979_vm2, %v2980_v59 }
  0xf1   : > { %v2535_v14 = vpop.f32.mrb[0].mxu0 }
  0xf2   : > { %v516_v15 = vadd.f32 %v2535_v14, %v2310_v13  ;;  %v507_v16 = vpop.f32.mrb[1].mxu0  ;;  %v3176_v14 = vld [vmem:[%s3602_s3 + $0x28] sm:$0xff] }
  0xf3   : > { %v508_v17 = vadd.f32 %v2310_v13, %v507_v16  ;;  %v2536_v18 = vpop.f32.mrb[2].mxu0  ;;  %v3181_v16 = vld [vmem:[%s3602_s3 + $0x20] sm:$0xff] }
  0xf4   : > { %v519_v19 = vadd.f32 %v2536_v18, %v2310_v13  ;;  %v510_v20 = vpop.f32.mrb[3].mxu0  ;;  %v540_v22 = vmax.f32 %v516_v15, 0.0 }
  0xf5   : > { %v511_v21 = vadd.f32 %v2310_v13, %v510_v20  ;;  %v538_v24 = vmax.f32 %v508_v17, 0.0 }
  0xf6   : > { %v541_v23 = vmax.f32 %v519_v19, 0.0 }
  0xf7   : > { %v539_v25 = vmax.f32 %v511_v21, 0.0 }
  0xf8   : > { %v3107_v26 = vpack.c.bf16 %v541_v23, %v540_v22  ;;  %v3190_v22 = vld [vmem:[%s3602_s3 + $0x38] sm:$0xff] }
  0xf9   : > { %v3109_v27 = vpack.c.bf16 %v539_v25, %v538_v24  ;;  %v2539_v28 = vpop.f32.mrb[4].mxu0  ;;  %v3195_v24 = vld [vmem:[%s3602_s3 + $0x30] sm:$0xff] }
  0xfa   : > { %v532_v29 = vadd.f32 %v2539_v28, %v2310_v13  ;;  %v523_v30 = vpop.f32.mrb[5].mxu0  ;;  %v556_v31 = vunpack.c.l.bf16 %v3107_v26  ;;  %v557_v39 = vunpack.c.h.bf16 %v3107_v26 }
  0xfb   : > { %v524_v32 = vadd.f32 %v2310_v13, %v523_v30  ;;  %v2540_v33 = vpop.f32.mrb[6].mxu0  ;;  %v554_v34 = vunpack.c.l.bf16 %v3109_v27  ;;  %v555_v43 = vunpack.c.h.bf16 %v3109_v27 }
  0xfc   : > { %v544_v35 = vmax.f32 %v532_v29, 0.0  ;;  %v535_v36 = vadd.f32 %v2540_v33, %v2310_v13  ;;  %v526_v37 = vpop.f32.mrb[7].mxu0  ;;  %v569_v38 = vsel %vm562_vm1, %v556_v31, 0.0  ;;  %v572_v47 = vsel %vm562_vm1, %v557_v39, 0.0  ;;  %v2882_v33 = vld [vmem:[%s3605_s6] sm:$0xff]   ;;  %v3236_v39 = vld [vmem:[%s3600_s1 + $0x8] sm:$0xff] }
  0xfd   : > { %v542_v40 = vmax.f32 %v524_v32, 0.0  ;;  %v527_v41 = vadd.f32 %v2310_v13, %v526_v37  ;;  %570 = vadd.xlane.f32.xlu1 %v569_v38  ;;  %v563_v42 = vsel %vm562_vm1, %v554_v34, 0.0  ;;  %v566_v49 = vsel %vm562_vm1, %v555_v43, 0.0  ;;  %v3204_v32 = vld [vmem:[%s3601_s2] sm:$0x3]  ;;  %2585 = vmatprep.subr.bf16.mxu0 %v2882_v33  ;;  %v2883_v34 = vld [vmem:[%s3605_s6 + $0x8] sm:$0xff]  }
  0xfe   : > { %v545_v44 = vmax.f32 %v535_v36, 0.0  ;;  %564 = vadd.xlane.f32.xlu0 %v563_v42  ;;  %v3258_v42 = vld [vmem:[%s3600_s1 + $0x20] sm:$0xff] }
  0xff   : > { %v543_v45 = vmax.f32 %v527_v41, 0.0  ;;  %v3253_v41 = vld [vmem:[%s3600_s1 + $0x18] sm:$0xff] }
 0x100   : > { %v3117_v46 = vpack.c.bf16 %v545_v44, %v544_v35 }
 0x101   : > { %v3120_v48 = vpack.c.bf16 %v543_v45, %v542_v40  ;;  %573 = vadd.xlane.f32.xlu1 %v572_v47  ;;  %v3242_v40 = vld [vmem:[%s3600_s1 + $0x10] sm:$0xff] }
 0x102   : > { %567 = vadd.xlane.f32.xlu0 %v566_v49  ;;  %v561_v54 = vunpack.c.h.bf16 %v3117_v46  ;;  %v560_v55 = vunpack.c.l.bf16 %v3117_v46  ;;  %v3281_v49 = vld [vmem:[%s3600_s1 + $0x38] sm:$0xff] }
 0x103   : > { %v559_v50 = vunpack.c.h.bf16 %v3120_v48  ;;  %v558_v51 = vunpack.c.l.bf16 %v3120_v48 }
 0x104   : > { %v584_v56 = vsel %vm562_vm1, %v561_v54, 0.0  ;;  %v581_v57 = vsel %vm562_vm1, %v560_v55, 0.0  ;;  %v2333_v55 = vld [vmem:[%s3607_s8] ss:$0 sm:$0xff] }
 0x105   : > { %v578_v52 = vsel %vm562_vm1, %v559_v50, 0.0  ;;  %v575_v53 = vsel %vm562_vm1, %v558_v51, 0.0 }
 0x106   : > { %579 = vadd.xlane.f32.xlu1 %v578_v52  ;;  %576 = vadd.xlane.f32.xlu0 %v575_v53 }
 0x10a   : > { %585 = vadd.xlane.f32.xlu1 %v584_v56  ;;  %582 = vadd.xlane.f32.xlu0 %v581_v57 }
 0x18a   : > { %v571_v2 = vpop.xlane.xlu1 %570 }
 0x18b   : > { %v565_v3 = vpop.xlane.xlu0 %564  ;;  %v589_v18 = vmul.f32 %v571_v2, %v3170_v11 }
 0x18c   : > { %v587_v9 = vmul.f32 %v565_v3, %v3153_v4 }
 0x18e   : > { %v574_v6 = vpop.xlane.xlu1 %573 }
 0x18f   : > { %v568_v8 = vpop.xlane.xlu0 %567  ;;  %v590_v12 = vmul.f32 %v574_v6, %v3163_v7 }
 0x190   : > { %v588_v10 = vmul.f32 %v568_v8, %v3158_v5 }
 0x191   : > { %v2769_v19 = vpack.c.bf16 %v590_v12, %v589_v18 }
 0x192   : > { %v2766_v13 = vpack.c.bf16 %v588_v10, %v587_v9 }
 0x193   : > { %v580_v15 = vpop.xlane.xlu1 %579  ;;  %v577_v17 = vpop.xlane.xlu0 %576 }
 0x194   : > { %2767 = vmatpush3.bf16.msra.mxu1 %v2766_v13  ;;  %v592_v20 = vmul.f32 %v580_v15, %v3176_v14  ;;  %v591_v21 = vmul.f32 %v577_v17, %v3181_v16 }
 0x195   : > { %2768 = vmatprep.subr.bf16.mxu1 %v2978_v58 }
 0x196   : > { %v2772_v28 = vpack.c.bf16 %v592_v20, %v591_v21 }
 0x197   : > { %v586_v23 = vpop.xlane.xlu1 %585  ;;  %v583_v25 = vpop.xlane.xlu0 %582 }
 0x198   : > { %2770 = vmatpush3.bf16.msra.mxu1 %v2769_v19  ;;  %v594_v29 = vmul.f32 %v586_v23, %v3190_v22  ;;  %v593_v30 = vmul.f32 %v583_v25, %v3195_v24 }
 0x199   : > { %2771 = vmatprep.subr.bf16.mxu1 %v2978_v58 }
 0x19a   : > { %v2775_v31 = vpack.c.bf16 %v594_v29, %v593_v30 }
 0x19c   : > { %2773 = vmatpush3.bf16.msra.mxu1 %v2772_v28 }
 0x19d   : > { %2774 = vmatprep.subr.bf16.mxu1 %v2978_v58 }
 0x1a0   : > { %2776 = vmatpush3.bf16.msra.mxu1 %v2775_v31 }
 0x1a3   : > { %2558 = vmatmul.mubr.msk.f32.vlgmr.msra.gmra.mrb[0].mxu1 %vm595_vm3, %v3204_v32 }
 0x276   : > { %v665_v35 = vpop.f32.mrb[0].mxu1 }
 0x277   : > { %v2559_v36 = vpop.f32.mrb[1].mxu1  ;;  %2569 = vmatmul.mubr.msk.f32.vlgmr.msra.gmra.mrb[8].mxu0 %vm562_vm1, %v665_v35 }
 0x278   : > { %2586 = vmatpush3.bf16.msra.mxu0 %v2882_v33  ;;  %2589 = vmatprep.mubr.msk.bf16.mxu0 %vm562_vm1, %v3109_v27  ;;  %v3229_v27 = vld [vmem:[%s3600_s1] sm:$0xff] }
 0x279   : > { %2587 = vmatprep.subr.bf16.mxu0 %v2883_v34  ;;  %2573 = vmatprep.mubr.msk.f32.mxu1 %vm743_vm4, %v3229_v27 }
 0x27c   : > { %2588 = vmatpush3.bf16.msra.mxu0 %v2883_v34 }
 0x27d   : > { %2795 = vmatprep.subr.bf16.mxu0 %v2978_v58 }
 0x27f   : > { %2590 = vmatmul.mubr.msk.bf16.vlgmr.msra.gmra.mrb[12].mxu0 %vm562_vm1, %v3107_v26 }
 0x280   : > { %2593 = vmatprep.mubr.msk.bf16.mxu0 %vm562_vm1, %v3120_v48  ;;  %v3272_v48 = vld [vmem:[%s3600_s1 + $0x30] sm:$0xff] }
 0x287   : > { %2594 = vmatmul.mubr.msk.bf16.gmra.mrb[16].mxu0 %vm562_vm1, %v3117_v46  ;;  %v3267_v46 = vld [vmem:[%s3600_s1 + $0x28] sm:$0xff] }
 0x288   : > { %2624 = vmatprep.mubr.msk.f32.mxu0 %vm2979_vm2, %v2980_v59 }
 0x34a   : > { %v738_v37 = vpop.f32.mrb[8].mxu0 }
 0x34b   : > { %v742_v26 = vmul.f32 0.03125, %v738_v37  ;;  %v2570_v38 = vpop.f32.mrb[9].mxu0 }
 0x34d   : > { %2571 = vmatprep.subr.msk.mxu1 %vm768_vm5, %v742_v26 }
 0x34e   : > { %2572 = vmatpush3.msk.msra.mxu1 %vm768_vm5, %v742_v26 }
 0x34f   : > { %2574 = vmatmul.mubr.msk.f32.vlgmr.msra.gmra.mrb[2].mxu1 %vm743_vm4, %v3236_v39  ;;  %2783 = vmatprep.subr.bf16.mxu1 %v2978_v58 }
 0x350   : > { %2576 = vmatprep.mubr.msk.f32.mxu1 %vm743_vm4, %v3242_v40 }
 0x352   : > { %v2591_v43 = vpop.f32.mrb[12].mxu0 }
 0x353   : > { %v939_v44 = vpop.f32.mrb[13].mxu0  ;;  %2577 = vmatmul.mubr.msk.f32.gmra.mrb[4].mxu1 %vm743_vm4, %v3253_v41 }
 0x354   : > { %v2592_v45 = vpop.f32.mrb[14].mxu0  ;;  %2579 = vmatprep.mubr.msk.f32.mxu1 %vm743_vm4, %v3258_v42 }
 0x355   : > { %v942_v47 = vpop.f32.mrb[15].mxu0 }
 0x357   : > { %2580 = vmatmul.mubr.msk.f32.gmra.mrb[6].mxu1 %vm743_vm4, %v3267_v46 }
 0x358   : > { %2582 = vmatprep.mubr.msk.f32.mxu1 %vm743_vm4, %v3272_v48 }
 0x35a   : > { %v2595_v50 = vpop.f32.mrb[16].mxu0 }
 0x35b   : > { %v955_v51 = vpop.f32.mrb[17].mxu0  ;;  %2583 = vmatmul.mubr.msk.f32.gmra.mrb[8].mxu1 %vm743_vm4, %v3281_v49 }
 0x35c   : > { %v2596_v52 = vpop.f32.mrb[18].mxu0  ;;  %2613 = vmatprep.mubr.msk.f32.mxu1 %vm2979_vm2, %v2980_v59 }
 0x35d   : > { %v958_v53 = vpop.f32.mrb[19].mxu0 }
 0x422   : > { %v2575_v54 = vpop.f32.mrb[2].mxu1 }
 0x423   : > { %v943_v56 = vadd.f32 %v2575_v54, %v942_v47  ;;  %v838_v57 = vpop.f32.mrb[3].mxu1 }
 0x424   : > { %v940_v60 = vadd.f32 %v939_v44, %v838_v57 }
 0x425   : > { %v976_v61 = vadd.f32 %v2333_v55, %v943_v56 }
 0x426   : > { %v975_v62 = vadd.f32 %v2333_v55, %v940_v60  ;;  %v2578_v63 = vpop.f32.mrb[4].mxu1  ;;  %v2334_v60 = vld [vmem:[%s3606_s7 + $0x20] sm:$0xff] }
 0x427   : > { %v951_v0 = vadd.f32 %v2592_v45, %v2578_v63  ;;  %v848_v1 = vpop.f32.mrb[5].mxu1 }
 0x428   : > { %v983_v2 = vpack.c.bf16 %v976_v61, %v975_v62  ;;  %v948_v3 = vadd.f32 %v2591_v43, %v848_v1  ;;  %v2335_v61 = vld [vmem:[%s3606_s7 + $0x28] sm:$0xff]  ;;  %v2336_v62 = vld [vmem:[%s3606_s7 + $0x30] sm:$0xff] }
 0x429   : > { %v978_v6 = vadd.f32 %v2333_v55, %v951_v0  ;;  %v2796_v63 = vpack.c.bf16 %v2335_v61, %v2334_v60  ;;  %v2337_v0 = vld [vmem:[%s3606_s7 + $0x38] sm:$0xff] }
 0x42a   : > { %2890 = vtanh.bf16 %v983_v2  ;;  %v977_v8 = vadd.f32 %v2333_v55, %v948_v3  ;;  %v2581_v9 = vpop.f32.mrb[6].mxu1  ;;  %v2799_v1 = vpack.c.bf16 %v2337_v0, %v2336_v62 }
 0x42b   : > { %v959_v10 = vadd.f32 %v2581_v9, %v958_v53  ;;  %v858_v12 = vpop.f32.mrb[7].mxu1  ;;  %2797 = vmatpush3.bf16.msra.mxu0 %v2796_v63 }
 0x42c   : > { %v984_v13 = vpack.c.bf16 %v978_v6, %v977_v8  ;;  %v956_v15 = vadd.f32 %v955_v51, %v858_v12  ;;  %2798 = vmatprep.subr.bf16.mxu0 %v2978_v58 }
 0x42d   : > { %v980_v17 = vadd.f32 %v2333_v55, %v959_v10 }
 0x42e   : > { %2892 = vtanh.bf16 %v984_v13  ;;  %v979_v18 = vadd.f32 %v2333_v55, %v956_v15  ;;  %v2584_v19 = vpop.f32.mrb[8].mxu1 }
 0x42f   : > { %v967_v20 = vadd.f32 %v2596_v52, %v2584_v19  ;;  %v868_v21 = vpop.f32.mrb[9].mxu1  ;;  %2800 = vmatpush3.bf16.msra.mxu0 %v2799_v1 }
 0x430   : > { %v985_v23 = vpack.c.bf16 %v980_v17, %v979_v18  ;;  %v964_v25 = vadd.f32 %v2595_v50, %v868_v21 }
 0x431   : > { %v982_v28 = vadd.f32 %v2333_v55, %v967_v20 }
 0x432   : > { %2894 = vtanh.bf16 %v985_v23  ;;  %v981_v29 = vadd.f32 %v2333_v55, %v964_v25 }
 0x434   : > { %v986_v30 = vpack.c.bf16 %v982_v28, %v981_v29 }
 0x435   : > { %v3290_v31 = vpop.eup %2890 }
 0x436   : > { %2896 = vtanh.bf16 %v986_v30  ;;  %v997_v33 = vunpack.c.h.bf16 %v3290_v31  ;;  %v996_v34 = vunpack.c.l.bf16 %v3290_v31 }
 0x438   : > { %v1007_v35 = vsel %vm562_vm1, %v997_v33, 0.0  ;;  %v1004_v36 = vsel %vm562_vm1, %v996_v34, 0.0  ;;  %v2884_v34 = vld [vmem:[%s3605_s6 + $0x10] sm:$0xff]  }
 0x439   : > { %v3296_v37 = vpop.eup %2892  ;;  %1008 = vadd.xlane.f32.xlu1 %v1007_v35  ;;  %1005 = vadd.xlane.f32.xlu0 %v1004_v36  ;;  %v2885_v35 = vld [vmem:[%s3605_s6 + $0x18] sm:$0xff]  }
 0x43a   : > { %v999_v26 = vunpack.c.h.bf16 %v3296_v37  ;;  %v998_v38 = vunpack.c.l.bf16 %v3296_v37  ;;  %2641 = vmatprep.subr.bf16.mxu0 %v2884_v34 }
 0x43c   : > { %v1013_v43 = vsel %vm562_vm1, %v999_v26, 0.0  ;;  %v1010_v44 = vsel %vm562_vm1, %v998_v38, 0.0 }
 0x43d   : > { %v3302_v45 = vpop.eup %2894  ;;  %1014 = vadd.xlane.f32.xlu1 %v1013_v43  ;;  %1011 = vadd.xlane.f32.xlu0 %v1010_v44 }
 0x43e   : > { %v1001_v47 = vunpack.c.h.bf16 %v3302_v45  ;;  %v1000_v50 = vunpack.c.l.bf16 %v3302_v45 }
 0x440   : > { %v1019_v51 = vsel %vm562_vm1, %v1001_v47, 0.0  ;;  %v1016_v52 = vsel %vm562_vm1, %v1000_v50, 0.0 }
 0x441   : > { %v2897_v53 = vpop.eup %2896  ;;  %1020 = vadd.xlane.f32.xlu1 %v1019_v51  ;;  %1017 = vadd.xlane.f32.xlu0 %v1016_v52 }
 0x442   : > { %v1003_v54 = vunpack.c.h.bf16 %v2897_v53  ;;  %v1002_v55 = vunpack.c.l.bf16 %v2897_v53 }
 0x444   : > { %v1025_v56 = vsel %vm562_vm1, %v1003_v54, 0.0  ;;  %v1022_v57 = vsel %vm562_vm1, %v1002_v55, 0.0  ;;  %v2359_v55 = vld [vmem:[%s3607_s8 + $0x1] ss:$0 sm:$0xff] }
 0x445   : > { %1026 = vadd.xlane.f32.xlu1 %v1025_v56  ;;  %1023 = vadd.xlane.f32.xlu0 %v1022_v57 }
 0x4c6   : > { %v1009_v2 = vpop.xlane.xlu1 %1008  ;;  %v1006_v3 = vpop.xlane.xlu0 %1005 }
 0x4c7   : > { %v1029_v6 = vmul.f32 %v1009_v2, %v3158_v5  ;;  %v1028_v8 = vmul.f32 %v1006_v3, %v3153_v4 }
 0x4c9   : > { %v2784_v9 = vpack.c.bf16 %v1029_v6, %v1028_v8 }
 0x4ca   : > { %v1015_v10 = vpop.xlane.xlu1 %1014  ;;  %v1012_v12 = vpop.xlane.xlu0 %1011 }
 0x4cb   : > { %v1031_v13 = vmul.f32 %v1015_v10, %v3163_v7  ;;  %v1030_v15 = vmul.f32 %v1012_v12, %v3170_v11  ;;  %2785 = vmatpush3.bf16.msra.mxu1 %v2784_v9 }
 0x4cc   : > { %2786 = vmatprep.subr.bf16.mxu1 %v2978_v58 }
 0x4cd   : > { %v2787_v17 = vpack.c.bf16 %v1031_v13, %v1030_v15 }
 0x4ce   : > { %v1021_v18 = vpop.xlane.xlu1 %1020  ;;  %v1018_v19 = vpop.xlane.xlu0 %1017 }
 0x4cf   : > { %v1033_v20 = vmul.f32 %v1021_v18, %v3176_v14  ;;  %v1032_v21 = vmul.f32 %v1018_v19, %v3181_v16  ;;  %2788 = vmatpush3.bf16.msra.mxu1 %v2787_v17 }
 0x4d0   : > { %2789 = vmatprep.subr.bf16.mxu1 %v2978_v58 }
 0x4d1   : > { %v2790_v23 = vpack.c.bf16 %v1033_v20, %v1032_v21 }
 0x4d2   : > { %v1027_v25 = vpop.xlane.xlu1 %1026  ;;  %v1024_v28 = vpop.xlane.xlu0 %1023 }
 0x4d3   : > { %v1035_v29 = vmul.f32 %v1027_v25, %v3190_v22  ;;  %v1034_v30 = vmul.f32 %v1024_v28, %v3195_v24  ;;  %2791 = vmatpush3.bf16.msra.mxu1 %v2790_v23 }
 0x4d4   : > { %2792 = vmatprep.subr.bf16.mxu1 %v2978_v58 }
 0x4d5   : > { %v2793_v33 = vpack.c.bf16 %v1035_v29, %v1034_v30 }
 0x4d7   : > { %2794 = vmatpush3.bf16.msra.mxu1 %v2793_v33 }
 0x4da   : > { %2614 = vmatmul.mubr.msk.f32.vlgmr.msra.gmra.mrb[10].mxu1 %vm595_vm3, %v3204_v32 }
 0x4db   : > { %2629 = vmatprep.mubr.msk.f32.mxu1 %vm743_vm4, %v3229_v27 }
 0x5ad   : > { %v1102_v36 = vpop.f32.mrb[10].mxu1 }
 0x5ae   : > { %v2615_v26 = vpop.f32.mrb[11].mxu1  ;;  %2625 = vmatmul.mubr.msk.f32.vlgmr.msra.gmra.mrb[10].mxu0 %vm562_vm1, %v1102_v36 }
 0x5af   : > { %2642 = vmatpush3.bf16.msra.mxu0 %v2884_v34  ;;  %2645 = vmatprep.mubr.msk.bf16.mxu0 %vm562_vm1, %v3290_v31 }
 0x5b0   : > { %2643 = vmatprep.subr.bf16.mxu0 %v2885_v35 }
 0x5b3   : > { %2644 = vmatpush3.bf16.msra.mxu0 %v2885_v35 }
 0x5b4   : > { %2801 = vmatprep.subr.bf16.mxu0 %v2978_v58 }
 0x5b6   : > { %2646 = vmatmul.mubr.msk.bf16.vlgmr.msra.gmra.mrb[20].mxu0 %vm562_vm1, %v3296_v37 }
 0x5b7   : > { %2649 = vmatprep.mubr.msk.bf16.mxu0 %vm562_vm1, %v3302_v45 }
 0x5be   : > { %2650 = vmatmul.mubr.msk.bf16.gmra.mrb[24].mxu0 %vm562_vm1, %v2897_v53 }
 0x5bf   : > { %2669 = vmatprep.mubr.msk.f32.mxu0 %vm2979_vm2, %v2980_v59 }
 0x681   : > { %v1175_v38 = vpop.f32.mrb[10].mxu0 }
 0x682   : > { %v1179_v43 = vmul.f32 0.03125, %v1175_v38  ;;  %v2626_v44 = vpop.f32.mrb[11].mxu0 }
 0x684   : > { %2627 = vmatprep.subr.msk.mxu1 %vm768_vm5, %v1179_v43 }
 0x685   : > { %2628 = vmatpush3.msk.msra.mxu1 %vm768_vm5, %v1179_v43 }
 0x686   : > { %2630 = vmatmul.mubr.msk.f32.vlgmr.msra.gmra.mrb[12].mxu1 %vm743_vm4, %v3236_v39  ;;  %2813 = vmatprep.subr.bf16.mxu1 %v2978_v58 }
 0x687   : > { %2632 = vmatprep.mubr.msk.f32.mxu1 %vm743_vm4, %v3242_v40 }
 0x689   : > { %v2647_v31 = vpop.f32.mrb[20].mxu0 }
 0x68a   : > { %v1351_v37 = vpop.f32.mrb[21].mxu0  ;;  %2633 = vmatmul.mubr.msk.f32.gmra.mrb[14].mxu1 %vm743_vm4, %v3253_v41 }
 0x68b   : > { %v2648_v45 = vpop.f32.mrb[22].mxu0  ;;  %2635 = vmatprep.mubr.msk.f32.mxu1 %vm743_vm4, %v3258_v42 }
 0x68c   : > { %v1354_v47 = vpop.f32.mrb[23].mxu0 }
 0x68e   : > { %2636 = vmatmul.mubr.msk.f32.gmra.mrb[16].mxu1 %vm743_vm4, %v3267_v46 }
 0x68f   : > { %2638 = vmatprep.mubr.msk.f32.mxu1 %vm743_vm4, %v3272_v48 }
 0x691   : > { %v2651_v50 = vpop.f32.mrb[24].mxu0 }
 0x692   : > { %v1367_v51 = vpop.f32.mrb[25].mxu0  ;;  %2639 = vmatmul.mubr.msk.f32.gmra.mrb[18].mxu1 %vm743_vm4, %v3281_v49 }
 0x693   : > { %v2652_v52 = vpop.f32.mrb[26].mxu0  ;;  %2680 = vmatprep.mubr.msk.f32.mxu1 %vm2979_vm2, %v2980_v59 }
 0x694   : > { %v1370_v53 = vpop.f32.mrb[27].mxu0 }
 0x759   : > { %v2631_v54 = vpop.f32.mrb[12].mxu1 }
 0x75a   : > { %v1355_v56 = vadd.f32 %v2631_v54, %v1354_v47  ;;  %v1249_v57 = vpop.f32.mrb[13].mxu1 }
 0x75b   : > { %v1352_v60 = vadd.f32 %v1351_v37, %v1249_v57 }
 0x75c   : > { %v1388_v61 = vadd.f32 %v2359_v55, %v1355_v56 }
 0x75d   : > { %v1387_v62 = vadd.f32 %v2359_v55, %v1352_v60  ;;  %v2634_v63 = vpop.f32.mrb[14].mxu1  ;;  %v2360_v60 = vld [vmem:[%s3606_s7 + $0x40] sm:$0xff] }
 0x75e   : > { %v1363_v0 = vadd.f32 %v2648_v45, %v2634_v63  ;;  %v1259_v1 = vpop.f32.mrb[15].mxu1 }
 0x75f   : > { %v1395_v2 = vpack.c.bf16 %v1388_v61, %v1387_v62  ;;  %v1360_v3 = vadd.f32 %v2647_v31, %v1259_v1  ;;  %v2361_v61 = vld [vmem:[%s3606_s7 + $0x48] sm:$0xff]  ;;  %v2362_v62 = vld [vmem:[%s3606_s7 + $0x50] sm:$0xff] }
 0x760   : > { %v1390_v6 = vadd.f32 %v2359_v55, %v1363_v0  ;;  %v2814_v63 = vpack.c.bf16 %v2361_v61, %v2360_v60  ;;  %v2363_v0 = vld [vmem:[%s3606_s7 + $0x58] sm:$0xff] }
 0x761   : > { %2898 = vtanh.bf16 %v1395_v2  ;;  %v1389_v8 = vadd.f32 %v2359_v55, %v1360_v3  ;;  %v2637_v9 = vpop.f32.mrb[16].mxu1  ;;  %v2817_v1 = vpack.c.bf16 %v2363_v0, %v2362_v62 }
 0x762   : > { %v1371_v10 = vadd.f32 %v2637_v9, %v1370_v53  ;;  %v1269_v12 = vpop.f32.mrb[17].mxu1  ;;  %2815 = vmatpush3.bf16.msra.mxu1 %v2814_v63 }
 0x763   : > { %v1396_v13 = vpack.c.bf16 %v1390_v6, %v1389_v8  ;;  %v1368_v15 = vadd.f32 %v1367_v51, %v1269_v12  ;;  %2816 = vmatprep.subr.bf16.mxu1 %v2978_v58 }
 0x764   : > { %v1392_v17 = vadd.f32 %v2359_v55, %v1371_v10 }
 0x765   : > { %2900 = vtanh.bf16 %v1396_v13  ;;  %v1391_v18 = vadd.f32 %v2359_v55, %v1368_v15  ;;  %v2640_v19 = vpop.f32.mrb[18].mxu1 }
 0x766   : > { %v1379_v20 = vadd.f32 %v2652_v52, %v2640_v19  ;;  %v1279_v21 = vpop.f32.mrb[19].mxu1  ;;  %2818 = vmatpush3.bf16.msra.mxu1 %v2817_v1 }
 0x767   : > { %v1397_v23 = vpack.c.bf16 %v1392_v17, %v1391_v18  ;;  %v1376_v25 = vadd.f32 %v2651_v50, %v1279_v21 }
 0x768   : > { %v1394_v28 = vadd.f32 %v2359_v55, %v1379_v20 }
 0x769   : > { %2902 = vtanh.bf16 %v1397_v23  ;;  %v1393_v29 = vadd.f32 %v2359_v55, %v1376_v25 }
 0x76b   : > { %v1398_v30 = vpack.c.bf16 %v1394_v28, %v1393_v29 }
 0x76c   : > { %v3377_v33 = vpop.eup %2898 }
 0x76d   : > { %2904 = vtanh.bf16 %v1398_v30  ;;  %v1409_v34 = vunpack.c.h.bf16 %v3377_v33  ;;  %v1408_v35 = vunpack.c.l.bf16 %v3377_v33 }
 0x76f   : > { %v1419_v36 = vsel %vm562_vm1, %v1409_v34, 0.0  ;;  %v1416_v26 = vsel %vm562_vm1, %v1408_v35, 0.0  ;;  %v2886_v35 = vld [vmem:[%s3605_s6 + $0x20] sm:$0xff]  }
 0x770   : > { %v3383_v38 = vpop.eup %2900  ;;  %1420 = vadd.xlane.f32.xlu1 %v1419_v36  ;;  %1417 = vadd.xlane.f32.xlu0 %v1416_v26  ;;  %v2887_v36 = vld [vmem:[%s3605_s6 + $0x28] sm:$0xff]  }
 0x771   : > { %v1411_v43 = vunpack.c.h.bf16 %v3383_v38  ;;  %v1410_v44 = vunpack.c.l.bf16 %v3383_v38  ;;  %2697 = vmatprep.subr.bf16.mxu1 %v2886_v35 }
 0x773   : > { %v1425_v31 = vsel %vm562_vm1, %v1411_v43, 0.0  ;;  %v1422_v37 = vsel %vm562_vm1, %v1410_v44, 0.0 }
 0x774   : > { %v3389_v45 = vpop.eup %2902  ;;  %1426 = vadd.xlane.f32.xlu1 %v1425_v31  ;;  %1423 = vadd.xlane.f32.xlu0 %v1422_v37 }
 0x775   : > { %v1413_v47 = vunpack.c.h.bf16 %v3389_v45  ;;  %v1412_v50 = vunpack.c.l.bf16 %v3389_v45 }
 0x777   : > { %v1431_v51 = vsel %vm562_vm1, %v1413_v47, 0.0  ;;  %v1428_v52 = vsel %vm562_vm1, %v1412_v50, 0.0 }
 0x778   : > { %v2905_v53 = vpop.eup %2904  ;;  %1432 = vadd.xlane.f32.xlu1 %v1431_v51  ;;  %1429 = vadd.xlane.f32.xlu0 %v1428_v52 }
 0x779   : > { %v1415_v54 = vunpack.c.h.bf16 %v2905_v53  ;;  %v1414_v55 = vunpack.c.l.bf16 %v2905_v53 }
 0x77b   : > { %v1437_v56 = vsel %vm562_vm1, %v1415_v54, 0.0  ;;  %v1434_v57 = vsel %vm562_vm1, %v1414_v55, 0.0  ;;  %v2385_v55 = vld [vmem:[%s3607_s8 + $0x2] ss:$0 sm:$0xff] }
 0x77c   : > { %1438 = vadd.xlane.f32.xlu1 %v1437_v56  ;;  %1435 = vadd.xlane.f32.xlu0 %v1434_v57 }
 0x7fd   : > { %v1421_v2 = vpop.xlane.xlu1 %1420  ;;  %v1418_v3 = vpop.xlane.xlu0 %1417 }
 0x7fe   : > { %v1441_v6 = vmul.f32 %v1421_v2, %v3158_v5  ;;  %v1440_v8 = vmul.f32 %v1418_v3, %v3153_v4 }
 0x800   : > { %v2802_v9 = vpack.c.bf16 %v1441_v6, %v1440_v8 }
 0x801   : > { %v1427_v10 = vpop.xlane.xlu1 %1426  ;;  %v1424_v12 = vpop.xlane.xlu0 %1423 }
 0x802   : > { %v1443_v13 = vmul.f32 %v1427_v10, %v3163_v7  ;;  %v1442_v15 = vmul.f32 %v1424_v12, %v3170_v11  ;;  %2803 = vmatpush3.bf16.msra.mxu0 %v2802_v9 }
 0x803   : > { %2804 = vmatprep.subr.bf16.mxu0 %v2978_v58 }
 0x804   : > { %v2805_v17 = vpack.c.bf16 %v1443_v13, %v1442_v15 }
 0x805   : > { %v1433_v18 = vpop.xlane.xlu1 %1432  ;;  %v1430_v19 = vpop.xlane.xlu0 %1429 }
 0x806   : > { %v1445_v20 = vmul.f32 %v1433_v18, %v3176_v14  ;;  %v1444_v21 = vmul.f32 %v1430_v19, %v3181_v16  ;;  %2806 = vmatpush3.bf16.msra.mxu0 %v2805_v17 }
 0x807   : > { %2807 = vmatprep.subr.bf16.mxu0 %v2978_v58 }
 0x808   : > { %v2808_v23 = vpack.c.bf16 %v1445_v20, %v1444_v21 }
 0x809   : > { %v1439_v25 = vpop.xlane.xlu1 %1438  ;;  %v1436_v28 = vpop.xlane.xlu0 %1435 }
 0x80a   : > { %v1447_v29 = vmul.f32 %v1439_v25, %v3190_v22  ;;  %v1446_v30 = vmul.f32 %v1436_v28, %v3195_v24  ;;  %2809 = vmatpush3.bf16.msra.mxu0 %v2808_v23 }
 0x80b   : > { %2810 = vmatprep.subr.bf16.mxu0 %v2978_v58 }
 0x80c   : > { %v2811_v34 = vpack.c.bf16 %v1447_v29, %v1446_v30 }
 0x80e   : > { %2812 = vmatpush3.bf16.msra.mxu0 %v2811_v34 }
 0x811   : > { %2670 = vmatmul.mubr.msk.f32.vlgmr.msra.gmra.mrb[28].mxu0 %vm595_vm3, %v3204_v32 }
 0x812   : > { %2685 = vmatprep.mubr.msk.f32.mxu0 %vm743_vm4, %v3229_v27 }
 0x8e4   : > { %v1514_v26 = vpop.f32.mrb[28].mxu0 }
 0x8e5   : > { %v2671_v43 = vpop.f32.mrb[29].mxu0  ;;  %2681 = vmatmul.mubr.msk.f32.vlgmr.msra.gmra.mrb[20].mxu1 %vm562_vm1, %v1514_v26 }
 0x8e6   : > { %2698 = vmatpush3.bf16.msra.mxu1 %v2886_v35  ;;  %2701 = vmatprep.mubr.msk.bf16.mxu1 %vm562_vm1, %v3377_v33 }
 0x8e7   : > { %2699 = vmatprep.subr.bf16.mxu1 %v2887_v36 }
 0x8ea   : > { %2700 = vmatpush3.bf16.msra.mxu1 %v2887_v36 }
 0x8eb   : > { %2831 = vmatprep.subr.bf16.mxu1 %v2978_v58 }
 0x8ed   : > { %2702 = vmatmul.mubr.msk.bf16.vlgmr.msra.gmra.mrb[24].mxu1 %vm562_vm1, %v3383_v38 }
 0x8ee   : > { %2705 = vmatprep.mubr.msk.bf16.mxu1 %vm562_vm1, %v3389_v45 }
 0x8f5   : > { %2706 = vmatmul.mubr.msk.bf16.gmra.mrb[28].mxu1 %vm562_vm1, %v2905_v53 }
 0x8f6   : > { %2736 = vmatprep.mubr.msk.f32.mxu1 %vm2979_vm2, %v2980_v59 }
 0x9b8   : > { %v1587_v44 = vpop.f32.mrb[20].mxu1 }
 0x9b9   : > { %v1591_v31 = vmul.f32 0.03125, %v1587_v44  ;;  %v2682_v37 = vpop.f32.mrb[21].mxu1 }
 0x9bb   : > { %2683 = vmatprep.subr.msk.mxu0 %vm768_vm5, %v1591_v31 }
 0x9bc   : > { %2684 = vmatpush3.msk.msra.mxu0 %vm768_vm5, %v1591_v31 }
 0x9bd   : > { %2686 = vmatmul.mubr.msk.f32.vlgmr.msra.gmra.mrb[30].mxu0 %vm743_vm4, %v3236_v39  ;;  %2819 = vmatprep.subr.bf16.mxu0 %v2978_v58 }
 0x9be   : > { %2688 = vmatprep.mubr.msk.f32.mxu0 %vm743_vm4, %v3242_v40 }
 0x9c0   : > { %v2703_v33 = vpop.f32.mrb[24].mxu1 }
 0x9c1   : > { %v1763_v38 = vpop.f32.mrb[25].mxu1  ;;  %2689 = vmatmul.mubr.msk.f32.gmra.mrb[32].mxu0 %vm743_vm4, %v3253_v41 }
 0x9c2   : > { %v2704_v45 = vpop.f32.mrb[26].mxu1  ;;  %2691 = vmatprep.mubr.msk.f32.mxu0 %vm743_vm4, %v3258_v42 }
 0x9c3   : > { %v1766_v47 = vpop.f32.mrb[27].mxu1 }
 0x9c5   : > { %2692 = vmatmul.mubr.msk.f32.gmra.mrb[34].mxu0 %vm743_vm4, %v3267_v46 }
 0x9c6   : > { %2694 = vmatprep.mubr.msk.f32.mxu0 %vm743_vm4, %v3272_v48 }
 0x9c8   : > { %v2707_v50 = vpop.f32.mrb[28].mxu1 }
 0x9c9   : > { %v1779_v51 = vpop.f32.mrb[29].mxu1  ;;  %2695 = vmatmul.mubr.msk.f32.gmra.mrb[36].mxu0 %vm743_vm4, %v3281_v49 }
 0x9ca   : > { %v2708_v52 = vpop.f32.mrb[30].mxu1  ;;  %2725 = vmatprep.mubr.msk.f32.mxu0 %vm2979_vm2, %v2980_v59 }
 0x9cb   : > { %v1782_v53 = vpop.f32.mrb[31].mxu1 }
 0xa90   : > { %v2687_v54 = vpop.f32.mrb[30].mxu0 }
 0xa91   : > { %v1767_v56 = vadd.f32 %v2687_v54, %v1766_v47  ;;  %v1661_v57 = vpop.f32.mrb[31].mxu0 }
 0xa92   : > { %v1764_v60 = vadd.f32 %v1763_v38, %v1661_v57  ;;  %v1815_v57 = vld [vmem:[%s3609_s10] sm:$0xff] }
 0xa93   : > { %v1800_v61 = vadd.f32 %v2385_v55, %v1767_v56 }
 0xa94   : > { %v1799_v62 = vadd.f32 %v2385_v55, %v1764_v60  ;;  %v2690_v63 = vpop.f32.mrb[32].mxu0  ;;  %v1816_v60 = vld [vmem:[%s3609_s10 + $0x8] sm:$0xff] }
 0xa95   : > { %v1775_v0 = vadd.f32 %v2704_v45, %v2690_v63  ;;  %v1671_v1 = vpop.f32.mrb[33].mxu0  ;;  %v1818_v63 = vld [vmem:[%s3609_s10 + $0x18] sm:$0xff] }
 0xa96   : > { %v1807_v2 = vpack.c.bf16 %v1800_v61, %v1799_v62  ;;  %v1772_v3 = vadd.f32 %v2703_v33, %v1671_v1  ;;  %v1817_v61 = vld [vmem:[%s3609_s10 + $0x10] sm:$0xff]  ;;  %v2832_v62 = vpack.c.bf16 %v1816_v60, %v1815_v57 }
 0xa97   : > { %v1802_v6 = vadd.f32 %v2385_v55, %v1775_v0  ;;  %v2835_v0 = vpack.c.bf16 %v1818_v63, %v1817_v61 }
 0xa98   : > { %2906 = vtanh.bf16 %v1807_v2  ;;  %v1801_v8 = vadd.f32 %v2385_v55, %v1772_v3  ;;  %v2693_v59 = vpop.f32.mrb[34].mxu0  ;;  %2833 = vmatpush3.bf16.msra.mxu1 %v2832_v62 }
 0xa99   : > { %v1783_v9 = vadd.f32 %v2693_v59, %v1782_v53  ;;  %v1681_v10 = vpop.f32.mrb[35].mxu0  ;;  %2834 = vmatprep.subr.bf16.mxu1 %v2978_v58 }
 0xa9a   : > { %v1808_v12 = vpack.c.bf16 %v1802_v6, %v1801_v8  ;;  %v1780_v13 = vadd.f32 %v1779_v51, %v1681_v10 }
 0xa9b   : > { %v1804_v15 = vadd.f32 %v2385_v55, %v1783_v9 }
 0xa9c   : > { %2908 = vtanh.bf16 %v1808_v12  ;;  %v1803_v17 = vadd.f32 %v2385_v55, %v1780_v13  ;;  %v2696_v18 = vpop.f32.mrb[36].mxu0  ;;  %2836 = vmatpush3.bf16.msra.mxu1 %v2835_v0 }
 0xa9d   : > { %v1791_v19 = vadd.f32 %v2708_v52, %v2696_v18  ;;  %v1691_v20 = vpop.f32.mrb[37].mxu0 }
 0xa9e   : > { %v1809_v21 = vpack.c.bf16 %v1804_v15, %v1803_v17  ;;  %v1788_v23 = vadd.f32 %v2707_v50, %v1691_v20 }
 0xa9f   : > { %v1806_v25 = vadd.f32 %v2385_v55, %v1791_v19 }
 0xaa0   : > { %2910 = vtanh.bf16 %v1809_v21  ;;  %v1805_v28 = vadd.f32 %v2385_v55, %v1788_v23 }
 0xaa2   : > { %v1810_v29 = vpack.c.bf16 %v1806_v25, %v1805_v28 }
 0xaa3   : > { %v3464_v30 = vpop.eup %2906 }
 0xaa4   : > { %2912 = vtanh.bf16 %v1810_v29  ;;  %v1820_v34 = vunpack.c.h.bf16 %v3464_v30  ;;  %v1819_v35 = vunpack.c.l.bf16 %v3464_v30 }
 0xaa6   : > { %v1830_v36 = vsel %vm562_vm1, %v1820_v34, 0.0  ;;  %v1827_v26 = vsel %vm562_vm1, %v1819_v35, 0.0 }
 0xaa7   : > { %v3470_v43 = vpop.eup %2908  ;;  %1831 = vadd.xlane.f32.xlu1 %v1830_v36  ;;  %1828 = vadd.xlane.f32.xlu0 %v1827_v26 }
 0xaa8   : > { %v1822_v44 = vunpack.c.h.bf16 %v3470_v43  ;;  %v1821_v31 = vunpack.c.l.bf16 %v3470_v43 }
 0xaaa   : > { %v1836_v37 = vsel %vm562_vm1, %v1822_v44, 0.0  ;;  %v1833_v33 = vsel %vm562_vm1, %v1821_v31, 0.0 }
 0xaab   : > { %v3476_v38 = vpop.eup %2910  ;;  %1837 = vadd.xlane.f32.xlu1 %v1836_v37  ;;  %1834 = vadd.xlane.f32.xlu0 %v1833_v33 }
 0xaac   : > { %v1824_v45 = vunpack.c.h.bf16 %v3476_v38  ;;  %v1823_v47 = vunpack.c.l.bf16 %v3476_v38 }
 0xaae   : > { %v1842_v50 = vsel %vm562_vm1, %v1824_v45, 0.0  ;;  %v1839_v51 = vsel %vm562_vm1, %v1823_v47, 0.0 }
 0xaaf   : > { %v2913_v52 = vpop.eup %2912  ;;  %1843 = vadd.xlane.f32.xlu1 %v1842_v50  ;;  %1840 = vadd.xlane.f32.xlu0 %v1839_v51 }
 0xab0   : > { %v1826_v53 = vunpack.c.h.bf16 %v2913_v52  ;;  %v1825_v54 = vunpack.c.l.bf16 %v2913_v52 }
 0xab2   : > { %v1848_v55 = vsel %vm562_vm1, %v1826_v53, 0.0  ;;  %v1845_v56 = vsel %vm562_vm1, %v1825_v54, 0.0 }
 0xab3   : > { %1849 = vadd.xlane.f32.xlu1 %v1848_v55  ;;  %1846 = vadd.xlane.f32.xlu0 %v1845_v56 }
 0xb34   : > { %v1832_v1 = vpop.xlane.xlu1 %1831  ;;  %v1829_v2 = vpop.xlane.xlu0 %1828 }
 0xb35   : > { %v1852_v3 = vmul.f32 %v1832_v1, %v3158_v5  ;;  %v1851_v6 = vmul.f32 %v1829_v2, %v3153_v4 }
 0xb37   : > { %v2820_v8 = vpack.c.bf16 %v1852_v3, %v1851_v6 }
 0xb38   : > { %v1838_v59 = vpop.xlane.xlu1 %1837  ;;  %v1835_v9 = vpop.xlane.xlu0 %1834 }
 0xb39   : > { %v1854_v10 = vmul.f32 %v1838_v59, %v3163_v7  ;;  %v1853_v12 = vmul.f32 %v1835_v9, %v3170_v11  ;;  %2821 = vmatpush3.bf16.msra.mxu0 %v2820_v8 }
 0xb3a   : > { %2822 = vmatprep.subr.bf16.mxu0 %v2978_v58 }
 0xb3b   : > { %v2823_v13 = vpack.c.bf16 %v1854_v10, %v1853_v12 }
 0xb3c   : > { %v1844_v15 = vpop.xlane.xlu1 %1843  ;;  %v1841_v17 = vpop.xlane.xlu0 %1840 }
 0xb3d   : > { %v1856_v18 = vmul.f32 %v1844_v15, %v3176_v14  ;;  %v1855_v19 = vmul.f32 %v1841_v17, %v3181_v16  ;;  %2824 = vmatpush3.bf16.msra.mxu0 %v2823_v13  ;;  %v2888_v14 = vld [vmem:[%s3608_s9] sm:$0xff]   ;;  %v2889_v16 = vld [vmem:[%s3608_s9 + $0x8] sm:$0xff]  }
 0xb3e   : > { %2825 = vmatprep.subr.bf16.mxu0 %v2978_v58  ;;  %2753 = vmatprep.subr.bf16.mxu1 %v2888_v14 }
 0xb3f   : > { %v2826_v4 = vpack.c.bf16 %v1856_v18, %v1855_v19 }
 0xb40   : > { %v1850_v5 = vpop.xlane.xlu1 %1849  ;;  %v1847_v20 = vpop.xlane.xlu0 %1846 }
 0xb41   : > { %v1858_v7 = vmul.f32 %v1850_v5, %v3190_v22  ;;  %v1857_v11 = vmul.f32 %v1847_v20, %v3195_v24  ;;  %2827 = vmatpush3.bf16.msra.mxu0 %v2826_v4 }
 0xb42   : > { %2828 = vmatprep.subr.bf16.mxu0 %v2978_v58 }
 0xb43   : > { %v2829_v21 = vpack.c.bf16 %v1858_v7, %v1857_v11 }
 0xb45   : > { %2830 = vmatpush3.bf16.msra.mxu0 %v2829_v21 }
 0xb48   : > { %2726 = vmatmul.mubr.msk.f32.vlgmr.msra.gmra.mrb[38].mxu0 %vm595_vm3, %v3204_v32 }
 0xb49   : > { %2741 = vmatprep.mubr.msk.f32.mxu0 %vm743_vm4, %v3229_v27 }
 0xc1b   : > { %v1925_v22 = vpop.f32.mrb[38].mxu0 }
 0xc1c   : > { %v2727_v24 = vpop.f32.mrb[39].mxu0  ;;  %2737 = vmatmul.mubr.msk.f32.vlgmr.msra.gmra.mrb[22].mxu1 %vm562_vm1, %v1925_v22 }
 0xc1d   : > { %2754 = vmatpush3.bf16.msra.mxu1 %v2888_v14  ;;  %2757 = vmatprep.mubr.msk.bf16.mxu1 %vm562_vm1, %v3464_v30 }
 0xc1e   : > { %2755 = vmatprep.subr.bf16.mxu1 %v2889_v16 }
 0xc21   : > { %2756 = vmatpush3.bf16.msra.mxu1 %v2889_v16 }
 0xc24   : > { %2758 = vmatmul.mubr.msk.bf16.vlgmr.msra.gmra.mrb[32].mxu1 %vm562_vm1, %v3470_v43 }
 0xc25   : > { %2761 = vmatprep.mubr.msk.bf16.mxu1 %vm562_vm1, %v3476_v38 }
 0xc2c   : > { %2762 = vmatmul.mubr.msk.bf16.gmra.mrb[36].mxu1 %vm562_vm1, %v2913_v52 }
 0xcef   : > { %v1998_v58 = vpop.f32.mrb[22].mxu1 }
 0xcf0   : > { %v2002_v32 = vmul.f32 0.03125, %v1998_v58  ;;  %v2738_v27 = vpop.f32.mrb[23].mxu1 }
 0xcf2   : > { %2739 = vmatprep.subr.msk.mxu0 %vm768_vm5, %v2002_v32 }
 0xcf3   : > { %2740 = vmatpush3.msk.msra.mxu0 %vm768_vm5, %v2002_v32 }
 0xcf4   : > { %2742 = vmatmul.mubr.msk.f32.vlgmr.msra.gmra.mrb[40].mxu0 %vm743_vm4, %v3236_v39 }
 0xcf5   : > { %2744 = vmatprep.mubr.msk.f32.mxu0 %vm743_vm4, %v3242_v40 }
 0xcf7   : > { %v2759_v23 = vpop.f32.mrb[32].mxu1 }
 0xcf8   : > { %v2173_v25 = vpop.f32.mrb[33].mxu1  ;;  %2745 = vmatmul.mubr.msk.f32.gmra.mrb[42].mxu0 %vm743_vm4, %v3253_v41 }
 0xcf9   : > { %v2760_v28 = vpop.f32.mrb[34].mxu1  ;;  %2747 = vmatprep.mubr.msk.f32.mxu0 %vm743_vm4, %v3258_v42  ;;  %v2403_v42 = vld [vmem:[%s3610_s11] ss:$0 sm:$0xff] }
 0xcfa   : > { %v2176_v29 = vpop.f32.mrb[35].mxu1 }
 0xcfc   : > { %2748 = vmatmul.mubr.msk.f32.gmra.mrb[44].mxu0 %vm743_vm4, %v3267_v46 }
 0xcfd   : > { %2750 = vmatprep.mubr.msk.f32.mxu0 %vm743_vm4, %v3272_v48 }
 0xcff   : > { %v2763_v39 = vpop.f32.mrb[36].mxu1 }
 0xd00   : > { %v2189_v30 = vpop.f32.mrb[37].mxu1  ;;  %2751 = vmatmul.mubr.msk.f32.gmra.mrb[46].mxu0 %vm743_vm4, %v3281_v49 }
 0xd01   : > { %v2764_v40 = vpop.f32.mrb[38].mxu1 }
 0xd02   : > { %v2192_v34 = vpop.f32.mrb[39].mxu1 }
 0xdc7   : > { %v2743_v41 = vpop.f32.mrb[40].mxu0 }
 0xdc8   : > { %v2177_v35 = vadd.f32 %v2743_v41, %v2176_v29  ;;  %v2072_v46 = vpop.f32.mrb[41].mxu0 }
 0xdc9   : > { %v2174_v36 = vadd.f32 %v2173_v25, %v2072_v46 }
 0xdca   : > { %v2212_v26 = vadd.f32 %v2403_v42, %v2177_v35 }
 0xdcb   : > { %v2211_v48 = vadd.f32 %v2403_v42, %v2174_v36  ;;  %v2746_v43 = vpop.f32.mrb[42].mxu0 }
 0xdcc   : > { %2220 = vst [vmem:[%s407_s17 + $0x8] sm:$0xff] %v2212_v26  ;;  %v2185_v49 = vadd.f32 %v2760_v28, %v2746_v43  ;;  %v2082_v44 = vpop.f32.mrb[43].mxu0 }
 0xdcd   : > { %2219 = vst [vmem:[%s407_s17] sm:$0xff] %v2211_v48  ;;  %v2182_v31 = vadd.f32 %v2759_v23, %v2082_v44 }
 0xdce   : > { %v2214_v37 = vadd.f32 %v2403_v42, %v2185_v49 }
 0xdcf   : > { %v2213_v33 = vadd.f32 %v2403_v42, %v2182_v31  ;;  %v2749_v38 = vpop.f32.mrb[44].mxu0 }
 0xdd0   : > { %2222 = vst [vmem:[%s407_s17 + $0x18] sm:$0xff] %v2214_v37  ;;  %v2193_v45 = vadd.f32 %v2749_v38, %v2192_v34  ;;  %v2092_v47 = vpop.f32.mrb[45].mxu0 }
 0xdd1   : > { %2221 = vst [vmem:[%s407_s17 + $0x10] sm:$0xff] %v2213_v33  ;;  %v2190_v50 = vadd.f32 %v2189_v30, %v2092_v47 }
 0xdd2   : > { %v2216_v51 = vadd.f32 %v2403_v42, %v2193_v45 }
 0xdd3   : > { %v2215_v52 = vadd.f32 %v2403_v42, %v2190_v50  ;;  %v2752_v53 = vpop.f32.mrb[46].mxu0 }
 0xdd4   : > { %2224 = vst [vmem:[%s407_s17 + $0x28] sm:$0xff] %v2216_v51  ;;  %v2201_v54 = vadd.f32 %v2764_v40, %v2752_v53  ;;  %v2102_v55 = vpop.f32.mrb[47].mxu0 }
 0xdd5   : > { %2223 = vst [vmem:[%s407_s17 + $0x20] sm:$0xff] %v2215_v52  ;;  %v2198_v56 = vadd.f32 %v2763_v39, %v2102_v55 }
 0xdd6   : > { %v2218_v57 = vadd.f32 %v2403_v42, %v2201_v54 }
 0xdd7   : > { %v2217_v60 = vadd.f32 %v2403_v42, %v2198_v56 }
 0xdd8   : > { %2226 = vst [vmem:[%s407_s17 + $0x38] sm:$0xff] %v2218_v57 }
 0xdd9   : > { %2225 = vst [vmem:[%s407_s17 + $0x30] sm:$0xff] %v2217_v60 }
 0xdda   : > { %2927 = shalt.err (!%p2924_p3)
}
 0xddb   : > { %s2928_s28 = scalar_lea.hbm %s3552_s29, 1024  ;;  %s2932_s16 = scalar_lea.hbm %s3611_s12, 2048 }
 0xddc   : > { %p2929_p4 = scmp.ne.s32.totalorder %s3552_s29, %s2928_s28  ;;  %p2933_p9 = scmp.lt.u32.totalorder %s3552_s29, %s3611_s12 }
 0xddd   : > { %p2934_p10 = scmp.lt.u32.totalorder %s2932_s16, %s2928_s28  ;;  %p2936_p12 = scmp.lt.u32.totalorder %s2928_s28, %s3552_s29 }
 0xdde   : > { %p2930_p7 = pnand %p2929_p4, %p3087_p5 }
 0xddf   : > { %p2935_p11 = por %p2934_p10, %p2933_p9 }
 0xde0   : > { %p2931_p8 = pneg %p2930_p7 }
 0xde1   : > { %p2937_p13 = por %p2936_p12, %p2935_p11 }
 0xde3   : > { %p2938_p0 = pnand %p2937_p13, %p2931_p8 }
 0xde5   : > { %2941 = shalt.err (!%p2938_p0)
}
 0xde6   : > { %s2982_s15 = smov 128   ;;  %s2983_s18 = smov 8  }
 0xde7   : > { %2837 = dma.vmem_to_hbm [thread:$0]  (%p3087_p5), %s3554_s19, 1024, %s3552_s29, %s3558_s25, %s2982_s15, %s2982_s15, %s2983_s18  }
 0xde8 PF: > { %p2843_p1 = scmp.ge.s32.totalorder %s2976_s24, 2  ;;  %s2256_s0 = sand.u32 1, %s2964_s21  }
 0xde9   : > { %s2257_s28 = scalar_lea.sflag [#allocation3], %s2256_s0 }
 0xdea   : > { %p2840_p2 = pnand %p2843_p1, %p3091_p6 }
 0xdec   : > { %2959 = dma.done.wait (!%p2840_p2), %s2257_s28, 1024  }
 0xded   : > { %2961 = vsyncadd (!%p2840_p2), %s2257_s28, 4294966272  ;;  %p22_p3 = scmp.ge.s32.totalorder %s3074_s27, 4   ;;  %s3616_s21 = smov %s2968_s22 }
 0xdee   : > { %s3617_s22 = smov %s2972_s23  ;;  %s3618_s23 = smov %s3085_s30 }
 0xdef   : > { %s3619_s24 = smov %s3074_s27  ;;  %24 = sbr.rel (!%p22_p3) target bundleno = 5 (0x5), region = 107 }
 0xdf6   :  { %2262 = vsyncpa [#allocation3], 1 }
 0xdf7   :  { %2264 = vsyncpa [#allocation3 + $0x1], 1 }

</bundles_post_ra>
